<compile_context>
chip_gen: v7x
topology: tpu7x:2x2x1
jax: 0.10.0
libtpu: 0.0.40
codegen_flags: <defaults>
</compile_context>

<pallas_src>
import functools
import math

import jax
import jax.numpy as jnp
from jax.experimental import pallas as pl
from jax.experimental.pallas import tpu as pltpu


# ----------------------------------------------------------------------------
# In-kernel helpers
# ----------------------------------------------------------------------------
def _ln_f32(x, a, b, eps):
    """Reference LayerNorm: unbiased std, divide by (std + eps)."""
    d = x.shape[-1]
    mean = jnp.mean(x, axis=-1, keepdims=True)
    diff = x - mean
    var = jnp.sum(diff * diff, axis=-1, keepdims=True) * (1.0 / (d - 1))
    std = jnp.sqrt(var)
    inv = pl.reciprocal(std + eps, approx=True)          # EUP, ~free
    return a * diff * inv + b


def _mha_core(q, k, v, mask, n_heads, scale):
    """q: (Tq, D) f32; k, v: (Tk, D) f32; mask: (Mq, Tk) f32 (Mq in {1, Tq}).

    Per-head masked softmax attention; all heads concatenated -> (Tq, D) f32.
    """
    d = q.shape[-1]
    dk = d // n_heads
    q = q * scale                                         # fold 1/sqrt(dk) once
    heads = []
    for h in range(n_heads):                              # static, small H
        lo = h * dk
        qh = q[:, lo:lo + dk].astype(jnp.bfloat16)
        kh = k[:, lo:lo + dk].astype(jnp.bfloat16)
        vh = v[:, lo:lo + dk].astype(jnp.bfloat16)
        # q @ k^T without an explicit transpose (contract last dims).
        s = jax.lax.dot_general(qh, kh, (((1,), (1,)), ((), ())),
                                preferred_element_type=jnp.float32)
        s = jnp.where(mask > 0, s, jnp.float32(-1e9))     # masked_fill in f32
        s = s - jnp.max(s, axis=-1, keepdims=True)
        p = jnp.exp(s)
        p = p * pl.reciprocal(jnp.sum(p, axis=-1, keepdims=True), approx=True)
        heads.append(jnp.dot(p.astype(jnp.bfloat16), vh,
                             preferred_element_type=jnp.float32))
    return jnp.concatenate(heads, axis=-1)                # (Tq, D) f32


# ----------------------------------------------------------------------------
# Pallas kernels
# ----------------------------------------------------------------------------
def _layernorm_kernel(x_ref, a_ref, b_ref, o_ref, *, eps):
    x = x_ref[...].astype(jnp.float32)
    o_ref[...] = _ln_f32(x, a_ref[...], b_ref[...], eps).astype(o_ref.dtype)


def _ln_linear_kernel(x_ref, a_ref, b_ref, w_ref, bias_ref, o_ref, *, eps, relu):
    """out = relu?( LN(x) @ W + bias )."""
    x = x_ref[...].astype(jnp.float32)
    h = _ln_f32(x, a_ref[...], b_ref[...], eps)
    y = jnp.dot(h.astype(jnp.bfloat16), w_ref[...].astype(jnp.bfloat16),
                preferred_element_type=jnp.float32)
    y = y + bias_ref[...]
    if relu:
        y = jnp.maximum(y, 0.0)
    o_ref[...] = y.astype(o_ref.dtype)


def _linear_kernel(x_ref, w_ref, bias_ref, o_ref):
    """out = x @ W + bias."""
    y = jnp.dot(x_ref[...].astype(jnp.bfloat16), w_ref[...].astype(jnp.bfloat16),
                preferred_element_type=jnp.float32)
    o_ref[...] = (y + bias_ref[...]).astype(o_ref.dtype)


def _linear_residual_kernel(x_ref, w_ref, bias_ref, res_ref, o_ref):
    """out = residual + x @ W + bias."""
    y = jnp.dot(x_ref[...].astype(jnp.bfloat16), w_ref[...].astype(jnp.bfloat16),
                preferred_element_type=jnp.float32)
    o_ref[...] = (y + bias_ref[...] + res_ref[...]).astype(o_ref.dtype)


def _self_attn_kernel(qkv_ref, m_ref, wo_ref, bo_ref, res_ref, o_ref,
                      *, n_heads, scale):
    """All heads + output projection + residual for one batch element."""
    qkv = qkv_ref[0]                                      # (T, 3D)
    d = qkv.shape[-1] // 3
    attn = _mha_core(qkv[:, :d], qkv[:, d:2 * d], qkv[:, 2 * d:],
                     m_ref[0], n_heads, scale)
    y = jnp.dot(attn.astype(jnp.bfloat16), wo_ref[...].astype(jnp.bfloat16),
                preferred_element_type=jnp.float32)
    o_ref[0] = (y + bo_ref[...] + res_ref[0]).astype(o_ref.dtype)


def _cross_attn_kernel(q_ref, kv_ref, m_ref, wo_ref, bo_ref, res_ref, o_ref,
                       *, n_heads, scale):
    """Cross-attention (q vs memory K|V) + output projection + residual."""
    d = q_ref.shape[-1]
    kv = kv_ref[0]                                        # (S, 2D)
    attn = _mha_core(q_ref[0], kv[:, :d], kv[:, d:], m_ref[0], n_heads, scale)
    y = jnp.dot(attn.astype(jnp.bfloat16), wo_ref[...].astype(jnp.bfloat16),
                preferred_element_type=jnp.float32)
    o_ref[0] = (y + bo_ref[...] + res_ref[0]).astype(o_ref.dtype)


# ----------------------------------------------------------------------------
# pallas_call wrappers
# ----------------------------------------------------------------------------
def _row_tile(rows):
    """Largest row tile (multiple of 8) that divides `rows`, else full."""
    for t in (512, 256, 128, 64, 32, 16, 8):
        if rows % t == 0:
            return t
    return rows


_ROW_PARAMS = pltpu.CompilerParams(dimension_semantics=("parallel",))


def layernorm(x2, a, b, eps=1e-6):
    rows, d = x2.shape
    tm = _row_tile(rows)
    return pl.pallas_call(
        functools.partial(_layernorm_kernel, eps=eps),
        out_shape=jax.ShapeDtypeStruct((rows, d), x2.dtype),
        grid=(rows // tm,),
        in_specs=[pl.BlockSpec((tm, d), lambda i: (i, 0)),
                  pl.BlockSpec((1, d), lambda i: (0, 0)),
                  pl.BlockSpec((1, d), lambda i: (0, 0))],
        out_specs=pl.BlockSpec((tm, d), lambda i: (i, 0)),
        compiler_params=_ROW_PARAMS,
    )(x2, a, b)


def ln_linear(x2, a, b, w, bias, *, relu=False, eps=1e-6):
    rows, din = x2.shape
    dout = w.shape[1]
    tm = _row_tile(rows)
    return pl.pallas_call(
        functools.partial(_ln_linear_kernel, eps=eps, relu=relu),
        out_shape=jax.ShapeDtypeStruct((rows, dout), x2.dtype),
        grid=(rows // tm,),
        in_specs=[pl.BlockSpec((tm, din), lambda i: (i, 0)),
                  pl.BlockSpec((1, din), lambda i: (0, 0)),
                  pl.BlockSpec((1, din), lambda i: (0, 0)),
                  pl.BlockSpec((din, dout), lambda i: (0, 0)),
                  pl.BlockSpec((1, dout), lambda i: (0, 0))],
        out_specs=pl.BlockSpec((tm, dout), lambda i: (i, 0)),
        compiler_params=_ROW_PARAMS,
    )(x2, a, b, w, bias)


def linear(x2, w, bias):
    rows, din = x2.shape
    dout = w.shape[1]
    tm = _row_tile(rows)
    return pl.pallas_call(
        _linear_kernel,
        out_shape=jax.ShapeDtypeStruct((rows, dout), x2.dtype),
        grid=(rows // tm,),
        in_specs=[pl.BlockSpec((tm, din), lambda i: (i, 0)),
                  pl.BlockSpec((din, dout), lambda i: (0, 0)),
                  pl.BlockSpec((1, dout), lambda i: (0, 0))],
        out_specs=pl.BlockSpec((tm, dout), lambda i: (i, 0)),
        compiler_params=_ROW_PARAMS,
    )(x2, w, bias)


def linear_residual(x2, w, bias, res2):
    rows, din = x2.shape
    dout = w.shape[1]
    tm = _row_tile(rows)
    return pl.pallas_call(
        _linear_residual_kernel,
        out_shape=jax.ShapeDtypeStruct((rows, dout), res2.dtype),
        grid=(rows // tm,),
        in_specs=[pl.BlockSpec((tm, din), lambda i: (i, 0)),
                  pl.BlockSpec((din, dout), lambda i: (0, 0)),
                  pl.BlockSpec((1, dout), lambda i: (0, 0)),
                  pl.BlockSpec((tm, dout), lambda i: (i, 0))],
        out_specs=pl.BlockSpec((tm, dout), lambda i: (i, 0)),
        compiler_params=_ROW_PARAMS,
    )(x2, w, bias, res2)


def self_attention_block(qkv, mask, wo, bo, res, n_heads):
    """qkv: (B, T, 3D); mask: (B, Mq, T); res: (B, T, D) -> (B, T, D)."""
    b, t, d3 = qkv.shape
    d = d3 // 3
    mq, tk = mask.shape[1], mask.shape[2]
    scale = 1.0 / math.sqrt(d // n_heads)
    return pl.pallas_call(
        functools.partial(_self_attn_kernel, n_heads=n_heads, scale=scale),
        out_shape=jax.ShapeDtypeStruct((b, t, d), res.dtype),
        grid=(b,),
        in_specs=[pl.BlockSpec((1, t, d3), lambda i: (i, 0, 0)),
                  pl.BlockSpec((1, mq, tk), lambda i: (i, 0, 0)),
                  pl.BlockSpec((d, d), lambda i: (0, 0)),
                  pl.BlockSpec((1, d), lambda i: (0, 0)),
                  pl.BlockSpec((1, t, d), lambda i: (i, 0, 0))],
        out_specs=pl.BlockSpec((1, t, d), lambda i: (i, 0, 0)),
        compiler_params=pltpu.CompilerParams(dimension_semantics=("parallel",)),
    )(qkv, mask, wo, bo, res)


def cross_attention_block(q, kv, mask, wo, bo, res, n_heads):
    """q: (B, T, D); kv: (B, S, 2D); mask: (B, Mq, S); res: (B, T, D)."""
    b, t, d = q.shape
    s = kv.shape[1]
    mq = mask.shape[1]
    scale = 1.0 / math.sqrt(d // n_heads)
    return pl.pallas_call(
        functools.partial(_cross_attn_kernel, n_heads=n_heads, scale=scale),
        out_shape=jax.ShapeDtypeStruct((b, t, d), res.dtype),
        grid=(b,),
        in_specs=[pl.BlockSpec((1, t, d), lambda i: (i, 0, 0)),
                  pl.BlockSpec((1, s, 2 * d), lambda i: (i, 0, 0)),
                  pl.BlockSpec((1, mq, s), lambda i: (i, 0, 0)),
                  pl.BlockSpec((d, d), lambda i: (0, 0)),
                  pl.BlockSpec((1, d), lambda i: (0, 0)),
                  pl.BlockSpec((1, t, d), lambda i: (i, 0, 0))],
        out_specs=pl.BlockSpec((1, t, d), lambda i: (i, 0, 0)),
        compiler_params=pltpu.CompilerParams(dimension_semantics=("parallel",)),
    )(q, kv, mask, wo, bo, res)


# ----------------------------------------------------------------------------
# Decoder (plain-JAX glue around the fused Pallas kernels)
# ----------------------------------------------------------------------------
def decoder_layer(p, x, memory, src_mask, tgt_mask, n_heads):
    b, t, d = x.shape
    s = memory.shape[1]
    x2 = x.reshape(b * t, d)
    mem2 = memory.reshape(b * s, d)

    # sublayer 0: x + SelfAttn(LN0(x))          (LN + fused QKV in one kernel,
    #                                            attn + out-proj + residual in one kernel)
    sa = p["self_attn"]
    qkv = ln_linear(x2, p["ln0_a"], p["ln0_b"], sa["w_qkv"], sa["b_qkv"])
    x = self_attention_block(qkv.reshape(b, t, 3 * d), tgt_mask,
                             sa["wo"], sa["bo"], x, n_heads)

    # sublayer 1: x + SrcAttn(LN1(x), memory)
    ca = p["src_attn"]
    x2 = x.reshape(b * t, d)
    q = ln_linear(x2, p["ln1_a"], p["ln1_b"], ca["wq"], ca["bq"])
    kv = linear(mem2, ca["w_kv"], ca["b_kv"])
    x = cross_attention_block(q.reshape(b, t, d), kv.reshape(b, s, 2 * d),
                              src_mask, ca["wo"], ca["bo"], x, n_heads)

    # sublayer 2: x + FFN(LN2(x))               (LN + W1 + ReLU; W2 + residual)
    x2 = x.reshape(b * t, d)
    h = ln_linear(x2, p["ln2_a"], p["ln2_b"], p["ff_w1"], p["ff_b1"], relu=True)
    x2 = linear_residual(h, p["ff_w2"], p["ff_b2"], x2)
    return x2.reshape(b, t, d)


def _decoder_forward(params, x, memory, src_mask, tgt_mask,
                     attn_pos=None, attn_pos_mem=None, bias=None, n_heads=4):
    # attn_pos / attn_pos_mem / bias intentionally unused (see TODO(synk) above).
    del attn_pos, attn_pos_mem, bias
    for layer_p in params["layers"]:
        x = decoder_layer(layer_p, x, memory, src_mask, tgt_mask, n_heads)
    b, t, d = x.shape
    out = layernorm(x.reshape(b * t, d), params["norm_a"], params["norm_b"])
    return out.reshape(b, t, d)


decoder_forward = jax.jit(_decoder_forward, static_argnames=("n_heads",))


# ----------------------------------------------------------------------------
# Deterministic parameter init
# ----------------------------------------------------------------------------
def _init_linear(key, din, dout):
    w = jax.random.normal(key, (din, dout), jnp.float32) * 0.02
    b = jnp.zeros((1, dout), jnp.float32)
    return w, b


def init_params(key, d_model, n_heads, d_ff, n_layers):
    layers = []
    for i in range(n_layers):
        lk = jax.random.fold_in(key, i)
        ks = jax.random.split(lk, 10)

        wq, bq = _init_linear(ks[0], d_model, d_model)
        wk, bk = _init_linear(ks[1], d_model, d_model)
        wv, bv = _init_linear(ks[2], d_model, d_model)
        wo, bo = _init_linear(ks[3], d_model, d_model)
        self_attn = {
            "w_qkv": jnp.concatenate([wq, wk, wv], axis=1),   # (D, 3D)
            "b_qkv": jnp.concatenate([bq, bk, bv], axis=1),   # (1, 3D)
            "wo": wo, "bo": bo,
        }

        cwq, cbq = _init_linear(ks[4], d_model, d_model)
        cwk, cbk = _init_linear(ks[5], d_model, d_model)
        cwv, cbv = _init_linear(ks[6], d_model, d_model)
        cwo, cbo = _init_linear(ks[7], d_model, d_model)
        src_attn = {
            "wq": cwq, "bq": cbq,
            "w_kv": jnp.concatenate([cwk, cwv], axis=1),      # (D, 2D)
            "b_kv": jnp.concatenate([cbk, cbv], axis=1),      # (1, 2D)
            "wo": cwo, "bo": cbo,
        }

        ff_w1, ff_b1 = _init_linear(ks[8], d_model, d_ff)
        ff_w2, ff_b2 = _init_linear(ks[9], d_ff, d_model)
        layers.append({
            "self_attn": self_attn,
            "src_attn": src_attn,
            "ff_w1": ff_w1, "ff_b1": ff_b1,
            "ff_w2": ff_w2, "ff_b2": ff_b2,
            "ln0_a": jnp.ones((1, d_model), jnp.float32), "ln0_b": jnp.zeros((1, d_model), jnp.float32),
            "ln1_a": jnp.ones((1, d_model), jnp.float32), "ln1_b": jnp.zeros((1, d_model), jnp.float32),
            "ln2_a": jnp.ones((1, d_model), jnp.float32), "ln2_b": jnp.zeros((1, d_model), jnp.float32),
        })
    return {
        "layers": layers,
        "norm_a": jnp.ones((1, d_model), jnp.float32),
        "norm_b": jnp.zeros((1, d_model), jnp.float32),
    }


# ----------------------------------------------------------------------------
# Main
# ----------------------------------------------------------------------------
if __name__ == "__main__":
    B, T, S, D, H, DFF, NLAYERS = 2, 8, 8, 32, 4, 64, 2  # small shapes

    root = jax.random.PRNGKey(0)
    kx, kmem, kp = jax.random.split(root, 3)

    x = jax.random.normal(kx, (B, T, D), jnp.float32)           # decoder input  (B, T, D)
    memory = jax.random.normal(kmem, (B, S, D), jnp.float32)    # encoder memory (B, S, D)

    # src_mask: (B, 1, S) key-padding mask (last 2 memory positions masked out)
    src_mask = jnp.ones((B, 1, S), jnp.float32).at[:, :, -2:].set(0.0)
    # tgt_mask: (B, T, T) causal (subsequent) mask
    tgt_mask = jnp.broadcast_to(jnp.tril(jnp.ones((T, T), jnp.float32)), (B, T, T))

    params = init_params(kp, D, H, DFF, NLAYERS)

    out = decoder_forward(params, x, memory, src_mask, tgt_mask, n_heads=H)
    jax.block_until_ready(out)
    assert out.shape == (B, T, D)
    assert bool(jnp.all(jnp.isfinite(out)))
    print("KERNEL_OK")
</pallas_src>

<mosaic_0001>
module attributes {stable_mosaic.version = 11 : i64} {
  func.func @_ln_linear_kernel(%arg0: i32, %arg1: memref<16x32xf32, #tpu.memory_space<vmem>>, %arg2: memref<1x32xf32, #tpu.memory_space<vmem>>, %arg3: memref<1x32xf32, #tpu.memory_space<vmem>>, %arg4: memref<32x96xf32, #tpu.memory_space<vmem>>, %arg5: memref<1x96xf32, #tpu.memory_space<vmem>>, %arg6: memref<16x96xf32, #tpu.memory_space<vmem>>) attributes {dimension_semantics = [#tpu.dimension_semantics<parallel>], iteration_bounds = array<i64: 1>, scalar_prefetch = 0 : i64, scratch_operands = 0 : i64, tpu.core_type = #tpu.core_type<tc>, window_params = [{transform_indices = @transform_0, window_bounds = array<i64: 16, 32>}, {pipeline_mode = #tpu.pipeline_mode<synchronous>, transform_indices = @transform_1, window_bounds = array<i64: 1, 32>}, {pipeline_mode = #tpu.pipeline_mode<synchronous>, transform_indices = @transform_2, window_bounds = array<i64: 1, 32>}, {pipeline_mode = #tpu.pipeline_mode<synchronous>, transform_indices = @transform_3, window_bounds = array<i64: 32, 96>}, {pipeline_mode = #tpu.pipeline_mode<synchronous>, transform_indices = @transform_4, window_bounds = array<i64: 1, 96>}, {transform_indices = @transform_5, window_bounds = array<i64: 16, 96>}]} {
    %c0 = arith.constant 0 : index
    %c0_0 = arith.constant 0 : index
    %0 = vector.load %arg1[%c0, %c0_0] : memref<16x32xf32, #tpu.memory_space<vmem>>, vector<16x32xf32>
    %c0_1 = arith.constant 0 : index
    %c0_2 = arith.constant 0 : index
    %1 = vector.load %arg2[%c0_1, %c0_2] : memref<1x32xf32, #tpu.memory_space<vmem>>, vector<1x32xf32>
    %c0_3 = arith.constant 0 : index
    %c0_4 = arith.constant 0 : index
    %2 = vector.load %arg3[%c0_3, %c0_4] : memref<1x32xf32, #tpu.memory_space<vmem>>, vector<1x32xf32>
    %cst = arith.constant dense<0.000000e+00> : vector<16xf32>
    %3 = vector.multi_reduction <add>, %0, %cst [1] : vector<16x32xf32> to vector<16xf32>
    %4 = vector.shape_cast %3 : vector<16xf32> to vector<16x1xf32>
    %cst_5 = arith.constant 3.200000e+01 : f32
    %5 = vector.broadcast %cst_5 : f32 to vector<16x1xf32>
    %6 = arith.divf %4, %5 : vector<16x1xf32>
    %7 = vector.broadcast %6 : vector<16x1xf32> to vector<16x32xf32>
    %8 = arith.subf %0, %7 : vector<16x32xf32>
    %9 = arith.mulf %8, %8 : vector<16x32xf32>
    %cst_6 = arith.constant dense<0.000000e+00> : vector<16xf32>
    %10 = vector.multi_reduction <add>, %9, %cst_6 [1] : vector<16x32xf32> to vector<16xf32>
    %11 = vector.shape_cast %10 : vector<16xf32> to vector<16x1xf32>
    %cst_7 = arith.constant 0.0322580636 : f32
    %12 = vector.broadcast %cst_7 : f32 to vector<16x1xf32>
    %13 = arith.mulf %11, %12 : vector<16x1xf32>
    %14 = math.sqrt %13 : vector<16x1xf32>
    %cst_8 = arith.constant 9.99999997E-7 : f32
    %15 = vector.broadcast %cst_8 : f32 to vector<16x1xf32>
    %16 = arith.addf %14, %15 : vector<16x1xf32>
    %17 = tpu.reciprocal %16 {approx = true} : vector<16x1xf32> -> vector<16x1xf32>
    %18 = vector.broadcast %1 : vector<1x32xf32> to vector<16x32xf32>
    %19 = arith.mulf %18, %8 : vector<16x32xf32>
    %20 = vector.broadcast %17 : vector<16x1xf32> to vector<16x32xf32>
    %21 = arith.mulf %19, %20 : vector<16x32xf32>
    %22 = vector.broadcast %2 : vector<1x32xf32> to vector<16x32xf32>
    %23 = arith.addf %21, %22 : vector<16x32xf32>
    %24 = arith.truncf %23 : vector<16x32xf32> to vector<16x32xbf16>
    %c0_9 = arith.constant 0 : index
    %c0_10 = arith.constant 0 : index
    %25 = vector.load %arg4[%c0_9, %c0_10] : memref<32x96xf32, #tpu.memory_space<vmem>>, vector<32x96xf32>
    %26 = arith.truncf %25 : vector<32x96xf32> to vector<32x96xbf16>
    %cst_11 = arith.constant dense<0.000000e+00> : vector<16x96xf32>
    %27 = tpu.matmul %24, %26, %cst_11 {dimension_numbers = #tpu.dot_dimension_numbers<[1], [0], [0], [1], [0, 0, 1, 1], [], []>} : vector<16x32xbf16>, vector<32x96xbf16>, vector<16x96xf32> -> vector<16x96xf32>
    %c0_12 = arith.constant 0 : index
    %c0_13 = arith.constant 0 : index
    %28 = vector.load %arg5[%c0_12, %c0_13] : memref<1x96xf32, #tpu.memory_space<vmem>>, vector<1x96xf32>
    %29 = vector.broadcast %28 : vector<1x96xf32> to vector<16x96xf32>
    %30 = arith.addf %27, %29 : vector<16x96xf32>
    %c0_14 = arith.constant 0 : index
    %c0_15 = arith.constant 0 : index
    %31 = vector.load %arg6[%c0_14, %c0_15] : memref<16x96xf32, #tpu.memory_space<vmem>>, vector<16x96xf32>
    tpu.vector_store %arg6[%c0_14, %c0_15], %30 {strides = array<i32>} : memref<16x96xf32, #tpu.memory_space<vmem>>, vector<16x96xf32>,
    return
  }
  func.func @transform_0(%arg0: i32) -> (i32, i32) {
    %c0_i32 = arith.constant 0 : i32
    %c0_i32_0 = arith.constant 0 : i32
    return %arg0, %c0_i32 : i32, i32
  }
  func.func @transform_1(%arg0: i32) -> (i32, i32) {
    %c0_i32 = arith.constant 0 : i32
    %c0_i32_0 = arith.constant 0 : i32
    %c0_i32_1 = arith.constant 0 : i32
    return %c0_i32, %c0_i32_0 : i32, i32
  }
  func.func @transform_2(%arg0: i32) -> (i32, i32) {
    %c0_i32 = arith.constant 0 : i32
    %c0_i32_0 = arith.constant 0 : i32
    %c0_i32_1 = arith.constant 0 : i32
    return %c0_i32, %c0_i32_0 : i32, i32
  }
  func.func @transform_3(%arg0: i32) -> (i32, i32) {
    %c0_i32 = arith.constant 0 : i32
    %c0_i32_0 = arith.constant 0 : i32
    %c0_i32_1 = arith.constant 0 : i32
    return %c0_i32, %c0_i32_0 : i32, i32
  }
  func.func @transform_4(%arg0: i32) -> (i32, i32) {
    %c0_i32 = arith.constant 0 : i32
    %c0_i32_0 = arith.constant 0 : i32
    %c0_i32_1 = arith.constant 0 : i32
    return %c0_i32, %c0_i32_0 : i32, i32
  }
  func.func @transform_5(%arg0: i32) -> (i32, i32) {
    %c0_i32 = arith.constant 0 : i32
    %c0_i32_0 = arith.constant 0 : i32
    return %arg0, %c0_i32 : i32, i32
  }
}

module attributes {stable_mosaic.version = 11 : i64} {
  func.func @_self_attn_kernel(%arg0: i32, %arg1: memref<1x8x96xf32, #tpu.memory_space<vmem>>, %arg2: memref<1x8x8xf32, #tpu.memory_space<vmem>>, %arg3: memref<32x32xf32, #tpu.memory_space<vmem>>, %arg4: memref<1x32xf32, #tpu.memory_space<vmem>>, %arg5: memref<1x8x32xf32, #tpu.memory_space<vmem>>, %arg6: memref<1x8x32xf32, #tpu.memory_space<vmem>>) attributes {dimension_semantics = [#tpu.dimension_semantics<parallel>], iteration_bounds = array<i64: 2>, scalar_prefetch = 0 : i64, scratch_operands = 0 : i64, tpu.core_type = #tpu.core_type<tc>, window_params = [{transform_indices = @transform_0, window_bounds = array<i64: 1, 8, 96>}, {transform_indices = @transform_1, window_bounds = array<i64: 1, 8, 8>}, {pipeline_mode = #tpu.pipeline_mode<synchronous>, transform_indices = @transform_2, window_bounds = array<i64: 32, 32>}, {pipeline_mode = #tpu.pipeline_mode<synchronous>, transform_indices = @transform_3, window_bounds = array<i64: 1, 32>}, {transform_indices = @transform_4, window_bounds = array<i64: 1, 8, 32>}, {transform_indices = @transform_5, window_bounds = array<i64: 1, 8, 32>}]} {
    %c0 = arith.constant 0 : index
    %c0_0 = arith.constant 0 : index
    %c0_1 = arith.constant 0 : index
    %0 = vector.load %arg1[%c0, %c0_0, %c0_1] : memref<1x8x96xf32, #tpu.memory_space<vmem>>, vector<1x8x96xf32>
    %1 = vector.shape_cast %0 : vector<1x8x96xf32> to vector<8x96xf32>
    %2 = vector.extract_strided_slice %1 {offsets = [0, 0], sizes = [8, 32], strides = [1, 1]} : vector<8x96xf32> to vector<8x32xf32>
    %3 = vector.extract_strided_slice %1 {offsets = [0, 32], sizes = [8, 32], strides = [1, 1]} : vector<8x96xf32> to vector<8x32xf32>
    %4 = vector.extract_strided_slice %1 {offsets = [0, 64], sizes = [8, 32], strides = [1, 1]} : vector<8x96xf32> to vector<8x32xf32>
    %c0_2 = arith.constant 0 : index
    %c0_3 = arith.constant 0 : index
    %c0_4 = arith.constant 0 : index
    %5 = vector.load %arg2[%c0_2, %c0_3, %c0_4] : memref<1x8x8xf32, #tpu.memory_space<vmem>>, vector<1x8x8xf32>
    %6 = vector.shape_cast %5 : vector<1x8x8xf32> to vector<8x8xf32>
    %cst = arith.constant 0.353553385 : f32
    %7 = vector.broadcast %cst : f32 to vector<8x32xf32>
    %8 = arith.mulf %2, %7 : vector<8x32xf32>
    %9 = vector.extract_strided_slice %8 {offsets = [0, 0], sizes = [8, 8], strides = [1, 1]} : vector<8x32xf32> to vector<8x8xf32>
    %10 = arith.truncf %9 : vector<8x8xf32> to vector<8x8xbf16>
    %11 = vector.extract_strided_slice %3 {offsets = [0, 0], sizes = [8, 8], strides = [1, 1]} : vector<8x32xf32> to vector<8x8xf32>
    %12 = arith.truncf %11 : vector<8x8xf32> to vector<8x8xbf16>
    %13 = vector.extract_strided_slice %4 {offsets = [0, 0], sizes = [8, 8], strides = [1, 1]} : vector<8x32xf32> to vector<8x8xf32>
    %14 = arith.truncf %13 : vector<8x8xf32> to vector<8x8xbf16>
    %cst_5 = arith.constant dense<0.000000e+00> : vector<8x8xf32>
    %15 = tpu.matmul %10, %12, %cst_5 {dimension_numbers = #tpu.dot_dimension_numbers<[1], [1], [0], [0], [0, 0, 1, 0], [], []>} : vector<8x8xbf16>, vector<8x8xbf16>, vector<8x8xf32> -> vector<8x8xf32>
    %cst_6 = arith.constant 0.000000e+00 : f32
    %16 = vector.broadcast %cst_6 : f32 to vector<8x8xf32>
    %17 = arith.cmpf ogt, %6, %16 : vector<8x8xf32>
    %cst_7 = arith.constant -1.000000e+09 : f32
    %18 = vector.broadcast %cst_7 : f32 to vector<8x8xf32>
    %19 = arith.select %17, %15, %18 : vector<8x8xi1>, vector<8x8xf32>
    %cst_8 = arith.constant dense<0xFF800000> : vector<8xf32>
    %20 = vector.multi_reduction <maximumf>, %19, %cst_8 [1] : vector<8x8xf32> to vector<8xf32>
    %21 = vector.shape_cast %20 : vector<8xf32> to vector<8x1xf32>
    %22 = vector.broadcast %21 : vector<8x1xf32> to vector<8x8xf32>
    %23 = arith.subf %19, %22 : vector<8x8xf32>
    %24 = math.exp %23 : vector<8x8xf32>
    %cst_9 = arith.constant dense<0.000000e+00> : vector<8xf32>
    %25 = vector.multi_reduction <add>, %24, %cst_9 [1] : vector<8x8xf32> to vector<8xf32>
    %26 = vector.shape_cast %25 : vector<8xf32> to vector<8x1xf32>
    %27 = tpu.reciprocal %26 {approx = true} : vector<8x1xf32> -> vector<8x1xf32>
    %28 = vector.broadcast %27 : vector<8x1xf32> to vector<8x8xf32>
    %29 = arith.mulf %24, %28 : vector<8x8xf32>
    %30 = arith.truncf %29 : vector<8x8xf32> to vector<8x8xbf16>
    %cst_10 = arith.constant dense<0.000000e+00> : vector<8x8xf32>
    %31 = tpu.matmul %30, %14, %cst_10 {dimension_numbers = #tpu.dot_dimension_numbers<[1], [0], [0], [1], [0, 0, 1, 1], [], []>} : vector<8x8xbf16>, vector<8x8xbf16>, vector<8x8xf32> -> vector<8x8xf32>
    %32 = vector.extract_strided_slice %8 {offsets = [0, 8], sizes = [8, 8], strides = [1, 1]} : vector<8x32xf32> to vector<8x8xf32>
    %33 = arith.truncf %32 : vector<8x8xf32> to vector<8x8xbf16>
    %34 = vector.extract_strided_slice %3 {offsets = [0, 8], sizes = [8, 8], strides = [1, 1]} : vector<8x32xf32> to vector<8x8xf32>
    %35 = arith.truncf %34 : vector<8x8xf32> to vector<8x8xbf16>
    %36 = vector.extract_strided_slice %4 {offsets = [0, 8], sizes = [8, 8], strides = [1, 1]} : vector<8x32xf32> to vector<8x8xf32>
    %37 = arith.truncf %36 : vector<8x8xf32> to vector<8x8xbf16>
    %cst_11 = arith.constant dense<0.000000e+00> : vector<8x8xf32>
    %38 = tpu.matmul %33, %35, %cst_11 {dimension_numbers = #tpu.dot_dimension_numbers<[1], [1], [0], [0], [0, 0, 1, 0], [], []>} : vector<8x8xbf16>, vector<8x8xbf16>, vector<8x8xf32> -> vector<8x8xf32>
    %cst_12 = arith.constant 0.000000e+00 : f32
    %39 = vector.broadcast %cst_12 : f32 to vector<8x8xf32>
    %40 = arith.cmpf ogt, %6, %39 : vector<8x8xf32>
    %cst_13 = arith.constant -1.000000e+09 : f32
    %41 = vector.broadcast %cst_13 : f32 to vector<8x8xf32>
    %42 = arith.select %40, %38, %41 : vector<8x8xi1>, vector<8x8xf32>
    %cst_14 = arith.constant dense<0xFF800000> : vector<8xf32>
    %43 = vector.multi_reduction <maximumf>, %42, %cst_14 [1] : vector<8x8xf32> to vector<8xf32>
    %44 = vector.shape_cast %43 : vector<8xf32> to vector<8x1xf32>
    %45 = vector.broadcast %44 : vector<8x1xf32> to vector<8x8xf32>
    %46 = arith.subf %42, %45 : vector<8x8xf32>
    %47 = math.exp %46 : vector<8x8xf32>
    %cst_15 = arith.constant dense<0.000000e+00> : vector<8xf32>
    %48 = vector.multi_reduction <add>, %47, %cst_15 [1] : vector<8x8xf32> to vector<8xf32>
    %49 = vector.shape_cast %48 : vector<8xf32> to vector<8x1xf32>
    %50 = tpu.reciprocal %49 {approx = true} : vector<8x1xf32> -> vector<8x1xf32>
    %51 = vector.broadcast %50 : vector<8x1xf32> to vector<8x8xf32>
    %52 = arith.mulf %47, %51 : vector<8x8xf32>
    %53 = arith.truncf %52 : vector<8x8xf32> to vector<8x8xbf16>
    %cst_16 = arith.constant dense<0.000000e+00> : vector<8x8xf32>
    %54 = tpu.matmul %53, %37, %cst_16 {dimension_numbers = #tpu.dot_dimension_numbers<[1], [0], [0], [1], [0, 0, 1, 1], [], []>} : vector<8x8xbf16>, vector<8x8xbf16>, vector<8x8xf32> -> vector<8x8xf32>
    %55 = vector.extract_strided_slice %8 {offsets = [0, 16], sizes = [8, 8], strides = [1, 1]} : vector<8x32xf32> to vector<8x8xf32>
    %56 = arith.truncf %55 : vector<8x8xf32> to vector<8x8xbf16>
    %57 = vector.extract_strided_slice %3 {offsets = [0, 16], sizes = [8, 8], strides = [1, 1]} : vector<8x32xf32> to vector<8x8xf32>
    %58 = arith.truncf %57 : vector<8x8xf32> to vector<8x8xbf16>
    %59 = vector.extract_strided_slice %4 {offsets = [0, 16], sizes = [8, 8], strides = [1, 1]} : vector<8x32xf32> to vector<8x8xf32>
    %60 = arith.truncf %59 : vector<8x8xf32> to vector<8x8xbf16>
    %cst_17 = arith.constant dense<0.000000e+00> : vector<8x8xf32>
    %61 = tpu.matmul %56, %58, %cst_17 {dimension_numbers = #tpu.dot_dimension_numbers<[1], [1], [0], [0], [0, 0, 1, 0], [], []>} : vector<8x8xbf16>, vector<8x8xbf16>, vector<8x8xf32> -> vector<8x8xf32>
    %cst_18 = arith.constant 0.000000e+00 : f32
    %62 = vector.broadcast %cst_18 : f32 to vector<8x8xf32>
    %63 = arith.cmpf ogt, %6, %62 : vector<8x8xf32>
    %cst_19 = arith.constant -1.000000e+09 : f32
    %64 = vector.broadcast %cst_19 : f32 to vector<8x8xf32>
    %65 = arith.select %63, %61, %64 : vector<8x8xi1>, vector<8x8xf32>
    %cst_20 = arith.constant dense<0xFF800000> : vector<8xf32>
    %66 = vector.multi_reduction <maximumf>, %65, %cst_20 [1] : vector<8x8xf32> to vector<8xf32>
    %67 = vector.shape_cast %66 : vector<8xf32> to vector<8x1xf32>
    %68 = vector.broadcast %67 : vector<8x1xf32> to vector<8x8xf32>
    %69 = arith.subf %65, %68 : vector<8x8xf32>
    %70 = math.exp %69 : vector<8x8xf32>
    %cst_21 = arith.constant dense<0.000000e+00> : vector<8xf32>
    %71 = vector.multi_reduction <add>, %70, %cst_21 [1] : vector<8x8xf32> to vector<8xf32>
    %72 = vector.shape_cast %71 : vector<8xf32> to vector<8x1xf32>
    %73 = tpu.reciprocal %72 {approx = true} : vector<8x1xf32> -> vector<8x1xf32>
    %74 = vector.broadcast %73 : vector<8x1xf32> to vector<8x8xf32>
    %75 = arith.mulf %70, %74 : vector<8x8xf32>
    %76 = arith.truncf %75 : vector<8x8xf32> to vector<8x8xbf16>
    %cst_22 = arith.constant dense<0.000000e+00> : vector<8x8xf32>
    %77 = tpu.matmul %76, %60, %cst_22 {dimension_numbers = #tpu.dot_dimension_numbers<[1], [0], [0], [1], [0, 0, 1, 1], [], []>} : vector<8x8xbf16>, vector<8x8xbf16>, vector<8x8xf32> -> vector<8x8xf32>
    %78 = vector.extract_strided_slice %8 {offsets = [0, 24], sizes = [8, 8], strides = [1, 1]} : vector<8x32xf32> to vector<8x8xf32>
    %79 = arith.truncf %78 : vector<8x8xf32> to vector<8x8xbf16>
    %80 = vector.extract_strided_slice %3 {offsets = [0, 24], sizes = [8, 8], strides = [1, 1]} : vector<8x32xf32> to vector<8x8xf32>
    %81 = arith.truncf %80 : vector<8x8xf32> to vector<8x8xbf16>
    %82 = vector.extract_strided_slice %4 {offsets = [0, 24], sizes = [8, 8], strides = [1, 1]} : vector<8x32xf32> to vector<8x8xf32>
    %83 = arith.truncf %82 : vector<8x8xf32> to vector<8x8xbf16>
    %cst_23 = arith.constant dense<0.000000e+00> : vector<8x8xf32>
    %84 = tpu.matmul %79, %81, %cst_23 {dimension_numbers = #tpu.dot_dimension_numbers<[1], [1], [0], [0], [0, 0, 1, 0], [], []>} : vector<8x8xbf16>, vector<8x8xbf16>, vector<8x8xf32> -> vector<8x8xf32>
    %cst_24 = arith.constant 0.000000e+00 : f32
    %85 = vector.broadcast %cst_24 : f32 to vector<8x8xf32>
    %86 = arith.cmpf ogt, %6, %85 : vector<8x8xf32>
    %cst_25 = arith.constant -1.000000e+09 : f32
    %87 = vector.broadcast %cst_25 : f32 to vector<8x8xf32>
    %88 = arith.select %86, %84, %87 : vector<8x8xi1>, vector<8x8xf32>
    %cst_26 = arith.constant dense<0xFF800000> : vector<8xf32>
    %89 = vector.multi_reduction <maximumf>, %88, %cst_26 [1] : vector<8x8xf32> to vector<8xf32>
    %90 = vector.shape_cast %89 : vector<8xf32> to vector<8x1xf32>
    %91 = vector.broadcast %90 : vector<8x1xf32> to vector<8x8xf32>
    %92 = arith.subf %88, %91 : vector<8x8xf32>
    %93 = math.exp %92 : vector<8x8xf32>
    %cst_27 = arith.constant dense<0.000000e+00> : vector<8xf32>
    %94 = vector.multi_reduction <add>, %93, %cst_27 [1] : vector<8x8xf32> to vector<8xf32>
    %95 = vector.shape_cast %94 : vector<8xf32> to vector<8x1xf32>
    %96 = tpu.reciprocal %95 {approx = true} : vector<8x1xf32> -> vector<8x1xf32>
    %97 = vector.broadcast %96 : vector<8x1xf32> to vector<8x8xf32>
    %98 = arith.mulf %93, %97 : vector<8x8xf32>
    %99 = arith.truncf %98 : vector<8x8xf32> to vector<8x8xbf16>
    %cst_28 = arith.constant dense<0.000000e+00> : vector<8x8xf32>
    %100 = tpu.matmul %99, %83, %cst_28 {dimension_numbers = #tpu.dot_dimension_numbers<[1], [0], [0], [1], [0, 0, 1, 1], [], []>} : vector<8x8xbf16>, vector<8x8xbf16>, vector<8x8xf32> -> vector<8x8xf32>
    %101 = tpu.concatenate %31, %54, %77, %100 in 1 : vector<8x8xf32>, vector<8x8xf32>, vector<8x8xf32>, vector<8x8xf32> -> vector<8x32xf32>
    %102 = arith.truncf %101 : vector<8x32xf32> to vector<8x32xbf16>
    %c0_29 = arith.constant 0 : index
    %c0_30 = arith.constant 0 : index
    %103 = vector.load %arg3[%c0_29, %c0_30] : memref<32x32xf32, #tpu.memory_space<vmem>>, vector<32x32xf32>
    %104 = arith.truncf %103 : vector<32x32xf32> to vector<32x32xbf16>
    %cst_31 = arith.constant dense<0.000000e+00> : vector<8x32xf32>
    %105 = tpu.matmul %102, %104, %cst_31 {dimension_numbers = #tpu.dot_dimension_numbers<[1], [0], [0], [1], [0, 0, 1, 1], [], []>} : vector<8x32xbf16>, vector<32x32xbf16>, vector<8x32xf32> -> vector<8x32xf32>
    %c0_32 = arith.constant 0 : index
    %c0_33 = arith.constant 0 : index
    %106 = vector.load %arg4[%c0_32, %c0_33] : memref<1x32xf32, #tpu.memory_space<vmem>>, vector<1x32xf32>
    %107 = vector.broadcast %106 : vector<1x32xf32> to vector<8x32xf32>
    %108 = arith.addf %105, %107 : vector<8x32xf32>
    %c0_34 = arith.constant 0 : index
    %c0_35 = arith.constant 0 : index
    %c0_36 = arith.constant 0 : index
    %109 = vector.load %arg5[%c0_34, %c0_35, %c0_36] : memref<1x8x32xf32, #tpu.memory_space<vmem>>, vector<1x8x32xf32>
    %110 = vector.shape_cast %109 : vector<1x8x32xf32> to vector<8x32xf32>
    %111 = arith.addf %108, %110 : vector<8x32xf32>
    %c0_37 = arith.constant 0 : index
    %c0_38 = arith.constant 0 : index
    %c0_39 = arith.constant 0 : index
    %112 = vector.load %arg6[%c0_37, %c0_38, %c0_39] : memref<1x8x32xf32, #tpu.memory_space<vmem>>, vector<1x8x32xf32>
    %113 = vector.shape_cast %112 : vector<1x8x32xf32> to vector<8x32xf32>
    %114 = vector.shape_cast %111 : vector<8x32xf32> to vector<1x8x32xf32>
    tpu.vector_store %arg6[%c0_37, %c0_38, %c0_39], %114 {strides = array<i32>} : memref<1x8x32xf32, #tpu.memory_space<vmem>>, vector<1x8x32xf32>,
    return
  }
  func.func @transform_0(%arg0: i32) -> (i32, i32, i32) {
    %c0_i32 = arith.constant 0 : i32
    %c0_i32_0 = arith.constant 0 : i32
    %c0_i32_1 = arith.constant 0 : i32
    return %arg0, %c0_i32, %c0_i32_0 : i32, i32, i32
  }
  func.func @transform_1(%arg0: i32) -> (i32, i32, i32) {
    %c0_i32 = arith.constant 0 : i32
    %c0_i32_0 = arith.constant 0 : i32
    %c0_i32_1 = arith.constant 0 : i32
    return %arg0, %c0_i32, %c0_i32_0 : i32, i32, i32
  }
  func.func @transform_2(%arg0: i32) -> (i32, i32) {
    %c0_i32 = arith.constant 0 : i32
    %c0_i32_0 = arith.constant 0 : i32
    %c0_i32_1 = arith.constant 0 : i32
    return %c0_i32, %c0_i32_0 : i32, i32
  }
  func.func @transform_3(%arg0: i32) -> (i32, i32) {
    %c0_i32 = arith.constant 0 : i32
    %c0_i32_0 = arith.constant 0 : i32
    %c0_i32_1 = arith.constant 0 : i32
    return %c0_i32, %c0_i32_0 : i32, i32
  }
  func.func @transform_4(%arg0: i32) -> (i32, i32, i32) {
    %c0_i32 = arith.constant 0 : i32
    %c0_i32_0 = arith.constant 0 : i32
    %c0_i32_1 = arith.constant 0 : i32
    return %arg0, %c0_i32, %c0_i32_0 : i32, i32, i32
  }
  func.func @transform_5(%arg0: i32) -> (i32, i32, i32) {
    %c0_i32 = arith.constant 0 : i32
    %c0_i32_0 = arith.constant 0 : i32
    %c0_i32_1 = arith.constant 0 : i32
    return %arg0, %c0_i32, %c0_i32_0 : i32, i32, i32
  }
}

module attributes {stable_mosaic.version = 11 : i64} {
  func.func @_linear_kernel(%arg0: i32, %arg1: memref<16x32xf32, #tpu.memory_space<vmem>>, %arg2: memref<32x64xf32, #tpu.memory_space<vmem>>, %arg3: memref<1x64xf32, #tpu.memory_space<vmem>>, %arg4: memref<16x64xf32, #tpu.memory_space<vmem>>) attributes {dimension_semantics = [#tpu.dimension_semantics<parallel>], iteration_bounds = array<i64: 1>, scalar_prefetch = 0 : i64, scratch_operands = 0 : i64, tpu.core_type = #tpu.core_type<tc>, window_params = [{transform_indices = @transform_0, window_bounds = array<i64: 16, 32>}, {pipeline_mode = #tpu.pipeline_mode<synchronous>, transform_indices = @transform_1, window_bounds = array<i64: 32, 64>}, {pipeline_mode = #tpu.pipeline_mode<synchronous>, transform_indices = @transform_2, window_bounds = array<i64: 1, 64>}, {transform_indices = @transform_3, window_bounds = array<i64: 16, 64>}]} {
    %c0 = arith.constant 0 : index
    %c0_0 = arith.constant 0 : index
    %0 = vector.load %arg1[%c0, %c0_0] : memref<16x32xf32, #tpu.memory_space<vmem>>, vector<16x32xf32>
    %1 = arith.truncf %0 : vector<16x32xf32> to vector<16x32xbf16>
    %c0_1 = arith.constant 0 : index
    %c0_2 = arith.constant 0 : index
    %2 = vector.load %arg2[%c0_1, %c0_2] : memref<32x64xf32, #tpu.memory_space<vmem>>, vector<32x64xf32>
    %3 = arith.truncf %2 : vector<32x64xf32> to vector<32x64xbf16>
    %cst = arith.constant dense<0.000000e+00> : vector<16x64xf32>
    %4 = tpu.matmul %1, %3, %cst {dimension_numbers = #tpu.dot_dimension_numbers<[1], [0], [0], [1], [0, 0, 1, 1], [], []>} : vector<16x32xbf16>, vector<32x64xbf16>, vector<16x64xf32> -> vector<16x64xf32>
    %c0_3 = arith.constant 0 : index
    %c0_4 = arith.constant 0 : index
    %5 = vector.load %arg3[%c0_3, %c0_4] : memref<1x64xf32, #tpu.memory_space<vmem>>, vector<1x64xf32>
    %6 = vector.broadcast %5 : vector<1x64xf32> to vector<16x64xf32>
    %7 = arith.addf %4, %6 : vector<16x64xf32>
    %c0_5 = arith.constant 0 : index
    %c0_6 = arith.constant 0 : index
    %8 = vector.load %arg4[%c0_5, %c0_6] : memref<16x64xf32, #tpu.memory_space<vmem>>, vector<16x64xf32>
    tpu.vector_store %arg4[%c0_5, %c0_6], %7 {strides = array<i32>} : memref<16x64xf32, #tpu.memory_space<vmem>>, vector<16x64xf32>,
    return
  }
  func.func @transform_0(%arg0: i32) -> (i32, i32) {
    %c0_i32 = arith.constant 0 : i32
    %c0_i32_0 = arith.constant 0 : i32
    return %arg0, %c0_i32 : i32, i32
  }
  func.func @transform_1(%arg0: i32) -> (i32, i32) {
    %c0_i32 = arith.constant 0 : i32
    %c0_i32_0 = arith.constant 0 : i32
    %c0_i32_1 = arith.constant 0 : i32
    return %c0_i32, %c0_i32_0 : i32, i32
  }
  func.func @transform_2(%arg0: i32) -> (i32, i32) {
    %c0_i32 = arith.constant 0 : i32
    %c0_i32_0 = arith.constant 0 : i32
    %c0_i32_1 = arith.constant 0 : i32
    return %c0_i32, %c0_i32_0 : i32, i32
  }
  func.func @transform_3(%arg0: i32) -> (i32, i32) {
    %c0_i32 = arith.constant 0 : i32
    %c0_i32_0 = arith.constant 0 : i32
    return %arg0, %c0_i32 : i32, i32
  }
}

module attributes {stable_mosaic.version = 11 : i64} {
  func.func @_ln_linear_kernel(%arg0: i32, %arg1: memref<16x32xf32, #tpu.memory_space<vmem>>, %arg2: memref<1x32xf32, #tpu.memory_space<vmem>>, %arg3: memref<1x32xf32, #tpu.memory_space<vmem>>, %arg4: memref<32x32xf32, #tpu.memory_space<vmem>>, %arg5: memref<1x32xf32, #tpu.memory_space<vmem>>, %arg6: memref<16x32xf32, #tpu.memory_space<vmem>>) attributes {dimension_semantics = [#tpu.dimension_semantics<parallel>], iteration_bounds = array<i64: 1>, scalar_prefetch = 0 : i64, scratch_operands = 0 : i64, tpu.core_type = #tpu.core_type<tc>, window_params = [{transform_indices = @transform_0, window_bounds = array<i64: 16, 32>}, {pipeline_mode = #tpu.pipeline_mode<synchronous>, transform_indices = @transform_1, window_bounds = array<i64: 1, 32>}, {pipeline_mode = #tpu.pipeline_mode<synchronous>, transform_indices = @transform_2, window_bounds = array<i64: 1, 32>}, {pipeline_mode = #tpu.pipeline_mode<synchronous>, transform_indices = @transform_3, window_bounds = array<i64: 32, 32>}, {pipeline_mode = #tpu.pipeline_mode<synchronous>, transform_indices = @transform_4, window_bounds = array<i64: 1, 32>}, {transform_indices = @transform_5, window_bounds = array<i64: 16, 32>}]} {
    %c0 = arith.constant 0 : index
    %c0_0 = arith.constant 0 : index
    %0 = vector.load %arg1[%c0, %c0_0] : memref<16x32xf32, #tpu.memory_space<vmem>>, vector<16x32xf32>
    %c0_1 = arith.constant 0 : index
    %c0_2 = arith.constant 0 : index
    %1 = vector.load %arg2[%c0_1, %c0_2] : memref<1x32xf32, #tpu.memory_space<vmem>>, vector<1x32xf32>
    %c0_3 = arith.constant 0 : index
    %c0_4 = arith.constant 0 : index
    %2 = vector.load %arg3[%c0_3, %c0_4] : memref<1x32xf32, #tpu.memory_space<vmem>>, vector<1x32xf32>
    %cst = arith.constant dense<0.000000e+00> : vector<16xf32>
    %3 = vector.multi_reduction <add>, %0, %cst [1] : vector<16x32xf32> to vector<16xf32>
    %4 = vector.shape_cast %3 : vector<16xf32> to vector<16x1xf32>
    %cst_5 = arith.constant 3.200000e+01 : f32
    %5 = vector.broadcast %cst_5 : f32 to vector<16x1xf32>
    %6 = arith.divf %4, %5 : vector<16x1xf32>
    %7 = vector.broadcast %6 : vector<16x1xf32> to vector<16x32xf32>
    %8 = arith.subf %0, %7 : vector<16x32xf32>
    %9 = arith.mulf %8, %8 : vector<16x32xf32>
    %cst_6 = arith.constant dense<0.000000e+00> : vector<16xf32>
    %10 = vector.multi_reduction <add>, %9, %cst_6 [1] : vector<16x32xf32> to vector<16xf32>
    %11 = vector.shape_cast %10 : vector<16xf32> to vector<16x1xf32>
    %cst_7 = arith.constant 0.0322580636 : f32
    %12 = vector.broadcast %cst_7 : f32 to vector<16x1xf32>
    %13 = arith.mulf %11, %12 : vector<16x1xf32>
    %14 = math.sqrt %13 : vector<16x1xf32>
    %cst_8 = arith.constant 9.99999997E-7 : f32
    %15 = vector.broadcast %cst_8 : f32 to vector<16x1xf32>
    %16 = arith.addf %14, %15 : vector<16x1xf32>
    %17 = tpu.reciprocal %16 {approx = true} : vector<16x1xf32> -> vector<16x1xf32>
    %18 = vector.broadcast %1 : vector<1x32xf32> to vector<16x32xf32>
    %19 = arith.mulf %18, %8 : vector<16x32xf32>
    %20 = vector.broadcast %17 : vector<16x1xf32> to vector<16x32xf32>
    %21 = arith.mulf %19, %20 : vector<16x32xf32>
    %22 = vector.broadcast %2 : vector<1x32xf32> to vector<16x32xf32>
    %23 = arith.addf %21, %22 : vector<16x32xf32>
    %24 = arith.truncf %23 : vector<16x32xf32> to vector<16x32xbf16>
    %c0_9 = arith.constant 0 : index
    %c0_10 = arith.constant 0 : index
    %25 = vector.load %arg4[%c0_9, %c0_10] : memref<32x32xf32, #tpu.memory_space<vmem>>, vector<32x32xf32>
    %26 = arith.truncf %25 : vector<32x32xf32> to vector<32x32xbf16>
    %cst_11 = arith.constant dense<0.000000e+00> : vector<16x32xf32>
    %27 = tpu.matmul %24, %26, %cst_11 {dimension_numbers = #tpu.dot_dimension_numbers<[1], [0], [0], [1], [0, 0, 1, 1], [], []>} : vector<16x32xbf16>, vector<32x32xbf16>, vector<16x32xf32> -> vector<16x32xf32>
    %c0_12 = arith.constant 0 : index
    %c0_13 = arith.constant 0 : index
    %28 = vector.load %arg5[%c0_12, %c0_13] : memref<1x32xf32, #tpu.memory_space<vmem>>, vector<1x32xf32>
    %29 = vector.broadcast %28 : vector<1x32xf32> to vector<16x32xf32>
    %30 = arith.addf %27, %29 : vector<16x32xf32>
    %c0_14 = arith.constant 0 : index
    %c0_15 = arith.constant 0 : index
    %31 = vector.load %arg6[%c0_14, %c0_15] : memref<16x32xf32, #tpu.memory_space<vmem>>, vector<16x32xf32>
    tpu.vector_store %arg6[%c0_14, %c0_15], %30 {strides = array<i32>} : memref<16x32xf32, #tpu.memory_space<vmem>>, vector<16x32xf32>,
    return
  }
  func.func @transform_0(%arg0: i32) -> (i32, i32) {
    %c0_i32 = arith.constant 0 : i32
    %c0_i32_0 = arith.constant 0 : i32
    return %arg0, %c0_i32 : i32, i32
  }
  func.func @transform_1(%arg0: i32) -> (i32, i32) {
    %c0_i32 = arith.constant 0 : i32
    %c0_i32_0 = arith.constant 0 : i32
    %c0_i32_1 = arith.constant 0 : i32
    return %c0_i32, %c0_i32_0 : i32, i32
  }
  func.func @transform_2(%arg0: i32) -> (i32, i32) {
    %c0_i32 = arith.constant 0 : i32
    %c0_i32_0 = arith.constant 0 : i32
    %c0_i32_1 = arith.constant 0 : i32
    return %c0_i32, %c0_i32_0 : i32, i32
  }
  func.func @transform_3(%arg0: i32) -> (i32, i32) {
    %c0_i32 = arith.constant 0 : i32
    %c0_i32_0 = arith.constant 0 : i32
    %c0_i32_1 = arith.constant 0 : i32
    return %c0_i32, %c0_i32_0 : i32, i32
  }
  func.func @transform_4(%arg0: i32) -> (i32, i32) {
    %c0_i32 = arith.constant 0 : i32
    %c0_i32_0 = arith.constant 0 : i32
    %c0_i32_1 = arith.constant 0 : i32
    return %c0_i32, %c0_i32_0 : i32, i32
  }
  func.func @transform_5(%arg0: i32) -> (i32, i32) {
    %c0_i32 = arith.constant 0 : i32
    %c0_i32_0 = arith.constant 0 : i32
    return %arg0, %c0_i32 : i32, i32
  }
}

module attributes {stable_mosaic.version = 11 : i64} {
  func.func @_cross_attn_kernel(%arg0: i32, %arg1: memref<1x8x32xf32, #tpu.memory_space<vmem>>, %arg2: memref<1x8x64xf32, #tpu.memory_space<vmem>>, %arg3: memref<1x1x8xf32, #tpu.memory_space<vmem>>, %arg4: memref<32x32xf32, #tpu.memory_space<vmem>>, %arg5: memref<1x32xf32, #tpu.memory_space<vmem>>, %arg6: memref<1x8x32xf32, #tpu.memory_space<vmem>>, %arg7: memref<1x8x32xf32, #tpu.memory_space<vmem>>) attributes {dimension_semantics = [#tpu.dimension_semantics<parallel>], iteration_bounds = array<i64: 2>, scalar_prefetch = 0 : i64, scratch_operands = 0 : i64, tpu.core_type = #tpu.core_type<tc>, window_params = [{transform_indices = @transform_0, window_bounds = array<i64: 1, 8, 32>}, {transform_indices = @transform_1, window_bounds = array<i64: 1, 8, 64>}, {transform_indices = @transform_2, window_bounds = array<i64: 1, 1, 8>}, {pipeline_mode = #tpu.pipeline_mode<synchronous>, transform_indices = @transform_3, window_bounds = array<i64: 32, 32>}, {pipeline_mode = #tpu.pipeline_mode<synchronous>, transform_indices = @transform_4, window_bounds = array<i64: 1, 32>}, {transform_indices = @transform_5, window_bounds = array<i64: 1, 8, 32>}, {transform_indices = @transform_6, window_bounds = array<i64: 1, 8, 32>}]} {
    %c0 = arith.constant 0 : index
    %c0_0 = arith.constant 0 : index
    %c0_1 = arith.constant 0 : index
    %0 = vector.load %arg2[%c0, %c0_0, %c0_1] : memref<1x8x64xf32, #tpu.memory_space<vmem>>, vector<1x8x64xf32>
    %1 = vector.shape_cast %0 : vector<1x8x64xf32> to vector<8x64xf32>
    %c0_2 = arith.constant 0 : index
    %c0_3 = arith.constant 0 : index
    %c0_4 = arith.constant 0 : index
    %2 = vector.load %arg1[%c0_2, %c0_3, %c0_4] : memref<1x8x32xf32, #tpu.memory_space<vmem>>, vector<1x8x32xf32>
    %3 = vector.shape_cast %2 : vector<1x8x32xf32> to vector<8x32xf32>
    %4 = vector.extract_strided_slice %1 {offsets = [0, 0], sizes = [8, 32], strides = [1, 1]} : vector<8x64xf32> to vector<8x32xf32>
    %5 = vector.extract_strided_slice %1 {offsets = [0, 32], sizes = [8, 32], strides = [1, 1]} : vector<8x64xf32> to vector<8x32xf32>
    %c0_5 = arith.constant 0 : index
    %c0_6 = arith.constant 0 : index
    %c0_7 = arith.constant 0 : index
    %6 = vector.load %arg3[%c0_5, %c0_6, %c0_7] : memref<1x1x8xf32, #tpu.memory_space<vmem>>, vector<1x1x8xf32>
    %7 = vector.shape_cast %6 : vector<1x1x8xf32> to vector<1x8xf32>
    %cst = arith.constant 0.353553385 : f32
    %8 = vector.broadcast %cst : f32 to vector<8x32xf32>
    %9 = arith.mulf %3, %8 : vector<8x32xf32>
    %10 = vector.extract_strided_slice %9 {offsets = [0, 0], sizes = [8, 8], strides = [1, 1]} : vector<8x32xf32> to vector<8x8xf32>
    %11 = arith.truncf %10 : vector<8x8xf32> to vector<8x8xbf16>
    %12 = vector.extract_strided_slice %4 {offsets = [0, 0], sizes = [8, 8], strides = [1, 1]} : vector<8x32xf32> to vector<8x8xf32>
    %13 = arith.truncf %12 : vector<8x8xf32> to vector<8x8xbf16>
    %14 = vector.extract_strided_slice %5 {offsets = [0, 0], sizes = [8, 8], strides = [1, 1]} : vector<8x32xf32> to vector<8x8xf32>
    %15 = arith.truncf %14 : vector<8x8xf32> to vector<8x8xbf16>
    %cst_8 = arith.constant dense<0.000000e+00> : vector<8x8xf32>
    %16 = tpu.matmul %11, %13, %cst_8 {dimension_numbers = #tpu.dot_dimension_numbers<[1], [1], [0], [0], [0, 0, 1, 0], [], []>} : vector<8x8xbf16>, vector<8x8xbf16>, vector<8x8xf32> -> vector<8x8xf32>
    %cst_9 = arith.constant 0.000000e+00 : f32
    %17 = vector.broadcast %cst_9 : f32 to vector<1x8xf32>
    %18 = arith.cmpf ogt, %7, %17 : vector<1x8xf32>
    %cst_10 = arith.constant -1.000000e+09 : f32
    %19 = vector.shape_cast %18 : vector<1x8xi1> to vector<1x8xi1>
    %20 = vector.broadcast %19 : vector<1x8xi1> to vector<8x8xi1>
    %21 = vector.broadcast %cst_10 : f32 to vector<8x8xf32>
    %22 = arith.select %20, %16, %21 : vector<8x8xi1>, vector<8x8xf32>
    %cst_11 = arith.constant dense<0xFF800000> : vector<8xf32>
    %23 = vector.multi_reduction <maximumf>, %22, %cst_11 [1] : vector<8x8xf32> to vector<8xf32>
    %24 = vector.shape_cast %23 : vector<8xf32> to vector<8x1xf32>
    %25 = vector.broadcast %24 : vector<8x1xf32> to vector<8x8xf32>
    %26 = arith.subf %22, %25 : vector<8x8xf32>
    %27 = math.exp %26 : vector<8x8xf32>
    %cst_12 = arith.constant dense<0.000000e+00> : vector<8xf32>
    %28 = vector.multi_reduction <add>, %27, %cst_12 [1] : vector<8x8xf32> to vector<8xf32>
    %29 = vector.shape_cast %28 : vector<8xf32> to vector<8x1xf32>
    %30 = tpu.reciprocal %29 {approx = true} : vector<8x1xf32> -> vector<8x1xf32>
    %31 = vector.broadcast %30 : vector<8x1xf32> to vector<8x8xf32>
    %32 = arith.mulf %27, %31 : vector<8x8xf32>
    %33 = arith.truncf %32 : vector<8x8xf32> to vector<8x8xbf16>
    %cst_13 = arith.constant dense<0.000000e+00> : vector<8x8xf32>
    %34 = tpu.matmul %33, %15, %cst_13 {dimension_numbers = #tpu.dot_dimension_numbers<[1], [0], [0], [1], [0, 0, 1, 1], [], []>} : vector<8x8xbf16>, vector<8x8xbf16>, vector<8x8xf32> -> vector<8x8xf32>
    %35 = vector.extract_strided_slice %9 {offsets = [0, 8], sizes = [8, 8], strides = [1, 1]} : vector<8x32xf32> to vector<8x8xf32>
    %36 = arith.truncf %35 : vector<8x8xf32> to vector<8x8xbf16>
    %37 = vector.extract_strided_slice %4 {offsets = [0, 8], sizes = [8, 8], strides = [1, 1]} : vector<8x32xf32> to vector<8x8xf32>
    %38 = arith.truncf %37 : vector<8x8xf32> to vector<8x8xbf16>
    %39 = vector.extract_strided_slice %5 {offsets = [0, 8], sizes = [8, 8], strides = [1, 1]} : vector<8x32xf32> to vector<8x8xf32>
    %40 = arith.truncf %39 : vector<8x8xf32> to vector<8x8xbf16>
    %cst_14 = arith.constant dense<0.000000e+00> : vector<8x8xf32>
    %41 = tpu.matmul %36, %38, %cst_14 {dimension_numbers = #tpu.dot_dimension_numbers<[1], [1], [0], [0], [0, 0, 1, 0], [], []>} : vector<8x8xbf16>, vector<8x8xbf16>, vector<8x8xf32> -> vector<8x8xf32>
    %cst_15 = arith.constant 0.000000e+00 : f32
    %42 = vector.broadcast %cst_15 : f32 to vector<1x8xf32>
    %43 = arith.cmpf ogt, %7, %42 : vector<1x8xf32>
    %cst_16 = arith.constant -1.000000e+09 : f32
    %44 = vector.shape_cast %43 : vector<1x8xi1> to vector<1x8xi1>
    %45 = vector.broadcast %44 : vector<1x8xi1> to vector<8x8xi1>
    %46 = vector.broadcast %cst_16 : f32 to vector<8x8xf32>
    %47 = arith.select %45, %41, %46 : vector<8x8xi1>, vector<8x8xf32>
    %cst_17 = arith.constant dense<0xFF800000> : vector<8xf32>
    %48 = vector.multi_reduction <maximumf>, %47, %cst_17 [1] : vector<8x8xf32> to vector<8xf32>
    %49 = vector.shape_cast %48 : vector<8xf32> to vector<8x1xf32>
    %50 = vector.broadcast %49 : vector<8x1xf32> to vector<8x8xf32>
    %51 = arith.subf %47, %50 : vector<8x8xf32>
    %52 = math.exp %51 : vector<8x8xf32>
    %cst_18 = arith.constant dense<0.000000e+00> : vector<8xf32>
    %53 = vector.multi_reduction <add>, %52, %cst_18 [1] : vector<8x8xf32> to vector<8xf32>
    %54 = vector.shape_cast %53 : vector<8xf32> to vector<8x1xf32>
    %55 = tpu.reciprocal %54 {approx = true} : vector<8x1xf32> -> vector<8x1xf32>
    %56 = vector.broadcast %55 : vector<8x1xf32> to vector<8x8xf32>
    %57 = arith.mulf %52, %56 : vector<8x8xf32>
    %58 = arith.truncf %57 : vector<8x8xf32> to vector<8x8xbf16>
    %cst_19 = arith.constant dense<0.000000e+00> : vector<8x8xf32>
    %59 = tpu.matmul %58, %40, %cst_19 {dimension_numbers = #tpu.dot_dimension_numbers<[1], [0], [0], [1], [0, 0, 1, 1], [], []>} : vector<8x8xbf16>, vector<8x8xbf16>, vector<8x8xf32> -> vector<8x8xf32>
    %60 = vector.extract_strided_slice %9 {offsets = [0, 16], sizes = [8, 8], strides = [1, 1]} : vector<8x32xf32> to vector<8x8xf32>
    %61 = arith.truncf %60 : vector<8x8xf32> to vector<8x8xbf16>
    %62 = vector.extract_strided_slice %4 {offsets = [0, 16], sizes = [8, 8], strides = [1, 1]} : vector<8x32xf32> to vector<8x8xf32>
    %63 = arith.truncf %62 : vector<8x8xf32> to vector<8x8xbf16>
    %64 = vector.extract_strided_slice %5 {offsets = [0, 16], sizes = [8, 8], strides = [1, 1]} : vector<8x32xf32> to vector<8x8xf32>
    %65 = arith.truncf %64 : vector<8x8xf32> to vector<8x8xbf16>
    %cst_20 = arith.constant dense<0.000000e+00> : vector<8x8xf32>
    %66 = tpu.matmul %61, %63, %cst_20 {dimension_numbers = #tpu.dot_dimension_numbers<[1], [1], [0], [0], [0, 0, 1, 0], [], []>} : vector<8x8xbf16>, vector<8x8xbf16>, vector<8x8xf32> -> vector<8x8xf32>
    %cst_21 = arith.constant 0.000000e+00 : f32
    %67 = vector.broadcast %cst_21 : f32 to vector<1x8xf32>
    %68 = arith.cmpf ogt, %7, %67 : vector<1x8xf32>
    %cst_22 = arith.constant -1.000000e+09 : f32
    %69 = vector.shape_cast %68 : vector<1x8xi1> to vector<1x8xi1>
    %70 = vector.broadcast %69 : vector<1x8xi1> to vector<8x8xi1>
    %71 = vector.broadcast %cst_22 : f32 to vector<8x8xf32>
    %72 = arith.select %70, %66, %71 : vector<8x8xi1>, vector<8x8xf32>
    %cst_23 = arith.constant dense<0xFF800000> : vector<8xf32>
    %73 = vector.multi_reduction <maximumf>, %72, %cst_23 [1] : vector<8x8xf32> to vector<8xf32>
    %74 = vector.shape_cast %73 : vector<8xf32> to vector<8x1xf32>
    %75 = vector.broadcast %74 : vector<8x1xf32> to vector<8x8xf32>
    %76 = arith.subf %72, %75 : vector<8x8xf32>
    %77 = math.exp %76 : vector<8x8xf32>
    %cst_24 = arith.constant dense<0.000000e+00> : vector<8xf32>
    %78 = vector.multi_reduction <add>, %77, %cst_24 [1] : vector<8x8xf32> to vector<8xf32>
    %79 = vector.shape_cast %78 : vector<8xf32> to vector<8x1xf32>
    %80 = tpu.reciprocal %79 {approx = true} : vector<8x1xf32> -> vector<8x1xf32>
    %81 = vector.broadcast %80 : vector<8x1xf32> to vector<8x8xf32>
    %82 = arith.mulf %77, %81 : vector<8x8xf32>
    %83 = arith.truncf %82 : vector<8x8xf32> to vector<8x8xbf16>
    %cst_25 = arith.constant dense<0.000000e+00> : vector<8x8xf32>
    %84 = tpu.matmul %83, %65, %cst_25 {dimension_numbers = #tpu.dot_dimension_numbers<[1], [0], [0], [1], [0, 0, 1, 1], [], []>} : vector<8x8xbf16>, vector<8x8xbf16>, vector<8x8xf32> -> vector<8x8xf32>
    %85 = vector.extract_strided_slice %9 {offsets = [0, 24], sizes = [8, 8], strides = [1, 1]} : vector<8x32xf32> to vector<8x8xf32>
    %86 = arith.truncf %85 : vector<8x8xf32> to vector<8x8xbf16>
    %87 = vector.extract_strided_slice %4 {offsets = [0, 24], sizes = [8, 8], strides = [1, 1]} : vector<8x32xf32> to vector<8x8xf32>
    %88 = arith.truncf %87 : vector<8x8xf32> to vector<8x8xbf16>
    %89 = vector.extract_strided_slice %5 {offsets = [0, 24], sizes = [8, 8], strides = [1, 1]} : vector<8x32xf32> to vector<8x8xf32>
    %90 = arith.truncf %89 : vector<8x8xf32> to vector<8x8xbf16>
    %cst_26 = arith.constant dense<0.000000e+00> : vector<8x8xf32>
    %91 = tpu.matmul %86, %88, %cst_26 {dimension_numbers = #tpu.dot_dimension_numbers<[1], [1], [0], [0], [0, 0, 1, 0], [], []>} : vector<8x8xbf16>, vector<8x8xbf16>, vector<8x8xf32> -> vector<8x8xf32>
    %cst_27 = arith.constant 0.000000e+00 : f32
    %92 = vector.broadcast %cst_27 : f32 to vector<1x8xf32>
    %93 = arith.cmpf ogt, %7, %92 : vector<1x8xf32>
    %cst_28 = arith.constant -1.000000e+09 : f32
    %94 = vector.shape_cast %93 : vector<1x8xi1> to vector<1x8xi1>
    %95 = vector.broadcast %94 : vector<1x8xi1> to vector<8x8xi1>
    %96 = vector.broadcast %cst_28 : f32 to vector<8x8xf32>
    %97 = arith.select %95, %91, %96 : vector<8x8xi1>, vector<8x8xf32>
    %cst_29 = arith.constant dense<0xFF800000> : vector<8xf32>
    %98 = vector.multi_reduction <maximumf>, %97, %cst_29 [1] : vector<8x8xf32> to vector<8xf32>
    %99 = vector.shape_cast %98 : vector<8xf32> to vector<8x1xf32>
    %100 = vector.broadcast %99 : vector<8x1xf32> to vector<8x8xf32>
    %101 = arith.subf %97, %100 : vector<8x8xf32>
    %102 = math.exp %101 : vector<8x8xf32>
    %cst_30 = arith.constant dense<0.000000e+00> : vector<8xf32>
    %103 = vector.multi_reduction <add>, %102, %cst_30 [1] : vector<8x8xf32> to vector<8xf32>
    %104 = vector.shape_cast %103 : vector<8xf32> to vector<8x1xf32>
    %105 = tpu.reciprocal %104 {approx = true} : vector<8x1xf32> -> vector<8x1xf32>
    %106 = vector.broadcast %105 : vector<8x1xf32> to vector<8x8xf32>
    %107 = arith.mulf %102, %106 : vector<8x8xf32>
    %108 = arith.truncf %107 : vector<8x8xf32> to vector<8x8xbf16>
    %cst_31 = arith.constant dense<0.000000e+00> : vector<8x8xf32>
    %109 = tpu.matmul %108, %90, %cst_31 {dimension_numbers = #tpu.dot_dimension_numbers<[1], [0], [0], [1], [0, 0, 1, 1], [], []>} : vector<8x8xbf16>, vector<8x8xbf16>, vector<8x8xf32> -> vector<8x8xf32>
    %110 = tpu.concatenate %34, %59, %84, %109 in 1 : vector<8x8xf32>, vector<8x8xf32>, vector<8x8xf32>, vector<8x8xf32> -> vector<8x32xf32>
    %111 = arith.truncf %110 : vector<8x32xf32> to vector<8x32xbf16>
    %c0_32 = arith.constant 0 : index
    %c0_33 = arith.constant 0 : index
    %112 = vector.load %arg4[%c0_32, %c0_33] : memref<32x32xf32, #tpu.memory_space<vmem>>, vector<32x32xf32>
    %113 = arith.truncf %112 : vector<32x32xf32> to vector<32x32xbf16>
    %cst_34 = arith.constant dense<0.000000e+00> : vector<8x32xf32>
    %114 = tpu.matmul %111, %113, %cst_34 {dimension_numbers = #tpu.dot_dimension_numbers<[1], [0], [0], [1], [0, 0, 1, 1], [], []>} : vector<8x32xbf16>, vector<32x32xbf16>, vector<8x32xf32> -> vector<8x32xf32>
    %c0_35 = arith.constant 0 : index
    %c0_36 = arith.constant 0 : index
    %115 = vector.load %arg5[%c0_35, %c0_36] : memref<1x32xf32, #tpu.memory_space<vmem>>, vector<1x32xf32>
    %116 = vector.broadcast %115 : vector<1x32xf32> to vector<8x32xf32>
    %117 = arith.addf %114, %116 : vector<8x32xf32>
    %c0_37 = arith.constant 0 : index
    %c0_38 = arith.constant 0 : index
    %c0_39 = arith.constant 0 : index
    %118 = vector.load %arg6[%c0_37, %c0_38, %c0_39] : memref<1x8x32xf32, #tpu.memory_space<vmem>>, vector<1x8x32xf32>
    %119 = vector.shape_cast %118 : vector<1x8x32xf32> to vector<8x32xf32>
    %120 = arith.addf %117, %119 : vector<8x32xf32>
    %c0_40 = arith.constant 0 : index
    %c0_41 = arith.constant 0 : index
    %c0_42 = arith.constant 0 : index
    %121 = vector.load %arg7[%c0_40, %c0_41, %c0_42] : memref<1x8x32xf32, #tpu.memory_space<vmem>>, vector<1x8x32xf32>
    %122 = vector.shape_cast %121 : vector<1x8x32xf32> to vector<8x32xf32>
    %123 = vector.shape_cast %120 : vector<8x32xf32> to vector<1x8x32xf32>
    tpu.vector_store %arg7[%c0_40, %c0_41, %c0_42], %123 {strides = array<i32>} : memref<1x8x32xf32, #tpu.memory_space<vmem>>, vector<1x8x32xf32>,
    return
  }
  func.func @transform_0(%arg0: i32) -> (i32, i32, i32) {
    %c0_i32 = arith.constant 0 : i32
    %c0_i32_0 = arith.constant 0 : i32
    %c0_i32_1 = arith.constant 0 : i32
    return %arg0, %c0_i32, %c0_i32_0 : i32, i32, i32
  }
  func.func @transform_1(%arg0: i32) -> (i32, i32, i32) {
    %c0_i32 = arith.constant 0 : i32
    %c0_i32_0 = arith.constant 0 : i32
    %c0_i32_1 = arith.constant 0 : i32
    return %arg0, %c0_i32, %c0_i32_0 : i32, i32, i32
  }
  func.func @transform_2(%arg0: i32) -> (i32, i32, i32) {
    %c0_i32 = arith.constant 0 : i32
    %c0_i32_0 = arith.constant 0 : i32
    %c0_i32_1 = arith.constant 0 : i32
    return %arg0, %c0_i32, %c0_i32_0 : i32, i32, i32
  }
  func.func @transform_3(%arg0: i32) -> (i32, i32) {
    %c0_i32 = arith.constant 0 : i32
    %c0_i32_0 = arith.constant 0 : i32
    %c0_i32_1 = arith.constant 0 : i32
    return %c0_i32, %c0_i32_0 : i32, i32
  }
  func.func @transform_4(%arg0: i32) -> (i32, i32) {
    %c0_i32 = arith.constant 0 : i32
    %c0_i32_0 = arith.constant 0 : i32
    %c0_i32_1 = arith.constant 0 : i32
    return %c0_i32, %c0_i32_0 : i32, i32
  }
  func.func @transform_5(%arg0: i32) -> (i32, i32, i32) {
    %c0_i32 = arith.constant 0 : i32
    %c0_i32_0 = arith.constant 0 : i32
    %c0_i32_1 = arith.constant 0 : i32
    return %arg0, %c0_i32, %c0_i32_0 : i32, i32, i32
  }
  func.func @transform_6(%arg0: i32) -> (i32, i32, i32) {
    %c0_i32 = arith.constant 0 : i32
    %c0_i32_0 = arith.constant 0 : i32
    %c0_i32_1 = arith.constant 0 : i32
    return %arg0, %c0_i32, %c0_i32_0 : i32, i32, i32
  }
}

module attributes {stable_mosaic.version = 11 : i64} {
  func.func @_ln_linear_kernel(%arg0: i32, %arg1: memref<16x32xf32, #tpu.memory_space<vmem>>, %arg2: memref<1x32xf32, #tpu.memory_space<vmem>>, %arg3: memref<1x32xf32, #tpu.memory_space<vmem>>, %arg4: memref<32x64xf32, #tpu.memory_space<vmem>>, %arg5: memref<1x64xf32, #tpu.memory_space<vmem>>, %arg6: memref<16x64xf32, #tpu.memory_space<vmem>>) attributes {dimension_semantics = [#tpu.dimension_semantics<parallel>], iteration_bounds = array<i64: 1>, scalar_prefetch = 0 : i64, scratch_operands = 0 : i64, tpu.core_type = #tpu.core_type<tc>, window_params = [{transform_indices = @transform_0, window_bounds = array<i64: 16, 32>}, {pipeline_mode = #tpu.pipeline_mode<synchronous>, transform_indices = @transform_1, window_bounds = array<i64: 1, 32>}, {pipeline_mode = #tpu.pipeline_mode<synchronous>, transform_indices = @transform_2, window_bounds = array<i64: 1, 32>}, {pipeline_mode = #tpu.pipeline_mode<synchronous>, transform_indices = @transform_3, window_bounds = array<i64: 32, 64>}, {pipeline_mode = #tpu.pipeline_mode<synchronous>, transform_indices = @transform_4, window_bounds = array<i64: 1, 64>}, {transform_indices = @transform_5, window_bounds = array<i64: 16, 64>}]} {
    %c0 = arith.constant 0 : index
    %c0_0 = arith.constant 0 : index
    %0 = vector.load %arg1[%c0, %c0_0] : memref<16x32xf32, #tpu.memory_space<vmem>>, vector<16x32xf32>
    %c0_1 = arith.constant 0 : index
    %c0_2 = arith.constant 0 : index
    %1 = vector.load %arg2[%c0_1, %c0_2] : memref<1x32xf32, #tpu.memory_space<vmem>>, vector<1x32xf32>
    %c0_3 = arith.constant 0 : index
    %c0_4 = arith.constant 0 : index
    %2 = vector.load %arg3[%c0_3, %c0_4] : memref<1x32xf32, #tpu.memory_space<vmem>>, vector<1x32xf32>
    %cst = arith.constant dense<0.000000e+00> : vector<16xf32>
    %3 = vector.multi_reduction <add>, %0, %cst [1] : vector<16x32xf32> to vector<16xf32>
    %4 = vector.shape_cast %3 : vector<16xf32> to vector<16x1xf32>
    %cst_5 = arith.constant 3.200000e+01 : f32
    %5 = vector.broadcast %cst_5 : f32 to vector<16x1xf32>
    %6 = arith.divf %4, %5 : vector<16x1xf32>
    %7 = vector.broadcast %6 : vector<16x1xf32> to vector<16x32xf32>
    %8 = arith.subf %0, %7 : vector<16x32xf32>
    %9 = arith.mulf %8, %8 : vector<16x32xf32>
    %cst_6 = arith.constant dense<0.000000e+00> : vector<16xf32>
    %10 = vector.multi_reduction <add>, %9, %cst_6 [1] : vector<16x32xf32> to vector<16xf32>
    %11 = vector.shape_cast %10 : vector<16xf32> to vector<16x1xf32>
    %cst_7 = arith.constant 0.0322580636 : f32
    %12 = vector.broadcast %cst_7 : f32 to vector<16x1xf32>
    %13 = arith.mulf %11, %12 : vector<16x1xf32>
    %14 = math.sqrt %13 : vector<16x1xf32>
    %cst_8 = arith.constant 9.99999997E-7 : f32
    %15 = vector.broadcast %cst_8 : f32 to vector<16x1xf32>
    %16 = arith.addf %14, %15 : vector<16x1xf32>
    %17 = tpu.reciprocal %16 {approx = true} : vector<16x1xf32> -> vector<16x1xf32>
    %18 = vector.broadcast %1 : vector<1x32xf32> to vector<16x32xf32>
    %19 = arith.mulf %18, %8 : vector<16x32xf32>
    %20 = vector.broadcast %17 : vector<16x1xf32> to vector<16x32xf32>
    %21 = arith.mulf %19, %20 : vector<16x32xf32>
    %22 = vector.broadcast %2 : vector<1x32xf32> to vector<16x32xf32>
    %23 = arith.addf %21, %22 : vector<16x32xf32>
    %24 = arith.truncf %23 : vector<16x32xf32> to vector<16x32xbf16>
    %c0_9 = arith.constant 0 : index
    %c0_10 = arith.constant 0 : index
    %25 = vector.load %arg4[%c0_9, %c0_10] : memref<32x64xf32, #tpu.memory_space<vmem>>, vector<32x64xf32>
    %26 = arith.truncf %25 : vector<32x64xf32> to vector<32x64xbf16>
    %cst_11 = arith.constant dense<0.000000e+00> : vector<16x64xf32>
    %27 = tpu.matmul %24, %26, %cst_11 {dimension_numbers = #tpu.dot_dimension_numbers<[1], [0], [0], [1], [0, 0, 1, 1], [], []>} : vector<16x32xbf16>, vector<32x64xbf16>, vector<16x64xf32> -> vector<16x64xf32>
    %c0_12 = arith.constant 0 : index
    %c0_13 = arith.constant 0 : index
    %28 = vector.load %arg5[%c0_12, %c0_13] : memref<1x64xf32, #tpu.memory_space<vmem>>, vector<1x64xf32>
    %29 = vector.broadcast %28 : vector<1x64xf32> to vector<16x64xf32>
    %30 = arith.addf %27, %29 : vector<16x64xf32>
    %cst_14 = arith.constant 0.000000e+00 : f32
    %31 = vector.broadcast %cst_14 : f32 to vector<16x64xf32>
    %32 = arith.maximumf %30, %31 : vector<16x64xf32>
    %c0_15 = arith.constant 0 : index
    %c0_16 = arith.constant 0 : index
    %33 = vector.load %arg6[%c0_15, %c0_16] : memref<16x64xf32, #tpu.memory_space<vmem>>, vector<16x64xf32>
    tpu.vector_store %arg6[%c0_15, %c0_16], %32 {strides = array<i32>} : memref<16x64xf32, #tpu.memory_space<vmem>>, vector<16x64xf32>,
    return
  }
  func.func @transform_0(%arg0: i32) -> (i32, i32) {
    %c0_i32 = arith.constant 0 : i32
    %c0_i32_0 = arith.constant 0 : i32
    return %arg0, %c0_i32 : i32, i32
  }
  func.func @transform_1(%arg0: i32) -> (i32, i32) {
    %c0_i32 = arith.constant 0 : i32
    %c0_i32_0 = arith.constant 0 : i32
    %c0_i32_1 = arith.constant 0 : i32
    return %c0_i32, %c0_i32_0 : i32, i32
  }
  func.func @transform_2(%arg0: i32) -> (i32, i32) {
    %c0_i32 = arith.constant 0 : i32
    %c0_i32_0 = arith.constant 0 : i32
    %c0_i32_1 = arith.constant 0 : i32
    return %c0_i32, %c0_i32_0 : i32, i32
  }
  func.func @transform_3(%arg0: i32) -> (i32, i32) {
    %c0_i32 = arith.constant 0 : i32
    %c0_i32_0 = arith.constant 0 : i32
    %c0_i32_1 = arith.constant 0 : i32
    return %c0_i32, %c0_i32_0 : i32, i32
  }
  func.func @transform_4(%arg0: i32) -> (i32, i32) {
    %c0_i32 = arith.constant 0 : i32
    %c0_i32_0 = arith.constant 0 : i32
    %c0_i32_1 = arith.constant 0 : i32
    return %c0_i32, %c0_i32_0 : i32, i32
  }
  func.func @transform_5(%arg0: i32) -> (i32, i32) {
    %c0_i32 = arith.constant 0 : i32
    %c0_i32_0 = arith.constant 0 : i32
    return %arg0, %c0_i32 : i32, i32
  }
}

module attributes {stable_mosaic.version = 11 : i64} {
  func.func @_linear_residual_kernel(%arg0: i32, %arg1: memref<16x64xf32, #tpu.memory_space<vmem>>, %arg2: memref<64x32xf32, #tpu.memory_space<vmem>>, %arg3: memref<1x32xf32, #tpu.memory_space<vmem>>, %arg4: memref<16x32xf32, #tpu.memory_space<vmem>>, %arg5: memref<16x32xf32, #tpu.memory_space<vmem>>) attributes {dimension_semantics = [#tpu.dimension_semantics<parallel>], iteration_bounds = array<i64: 1>, scalar_prefetch = 0 : i64, scratch_operands = 0 : i64, tpu.core_type = #tpu.core_type<tc>, window_params = [{transform_indices = @transform_0, window_bounds = array<i64: 16, 64>}, {pipeline_mode = #tpu.pipeline_mode<synchronous>, transform_indices = @transform_1, window_bounds = array<i64: 64, 32>}, {pipeline_mode = #tpu.pipeline_mode<synchronous>, transform_indices = @transform_2, window_bounds = array<i64: 1, 32>}, {transform_indices = @transform_3, window_bounds = array<i64: 16, 32>}, {transform_indices = @transform_4, window_bounds = array<i64: 16, 32>}]} {
    %c0 = arith.constant 0 : index
    %c0_0 = arith.constant 0 : index
    %0 = vector.load %arg1[%c0, %c0_0] : memref<16x64xf32, #tpu.memory_space<vmem>>, vector<16x64xf32>
    %1 = arith.truncf %0 : vector<16x64xf32> to vector<16x64xbf16>
    %c0_1 = arith.constant 0 : index
    %c0_2 = arith.constant 0 : index
    %2 = vector.load %arg2[%c0_1, %c0_2] : memref<64x32xf32, #tpu.memory_space<vmem>>, vector<64x32xf32>
    %3 = arith.truncf %2 : vector<64x32xf32> to vector<64x32xbf16>
    %cst = arith.constant dense<0.000000e+00> : vector<16x32xf32>
    %4 = tpu.matmul %1, %3, %cst {dimension_numbers = #tpu.dot_dimension_numbers<[1], [0], [0], [1], [0, 0, 1, 1], [], []>} : vector<16x64xbf16>, vector<64x32xbf16>, vector<16x32xf32> -> vector<16x32xf32>
    %c0_3 = arith.constant 0 : index
    %c0_4 = arith.constant 0 : index
    %5 = vector.load %arg3[%c0_3, %c0_4] : memref<1x32xf32, #tpu.memory_space<vmem>>, vector<1x32xf32>
    %6 = vector.broadcast %5 : vector<1x32xf32> to vector<16x32xf32>
    %7 = arith.addf %4, %6 : vector<16x32xf32>
    %c0_5 = arith.constant 0 : index
    %c0_6 = arith.constant 0 : index
    %8 = vector.load %arg4[%c0_5, %c0_6] : memref<16x32xf32, #tpu.memory_space<vmem>>, vector<16x32xf32>
    %9 = arith.addf %7, %8 : vector<16x32xf32>
    %c0_7 = arith.constant 0 : index
    %c0_8 = arith.constant 0 : index
    %10 = vector.load %arg5[%c0_7, %c0_8] : memref<16x32xf32, #tpu.memory_space<vmem>>, vector<16x32xf32>
    tpu.vector_store %arg5[%c0_7, %c0_8], %9 {strides = array<i32>} : memref<16x32xf32, #tpu.memory_space<vmem>>, vector<16x32xf32>,
    return
  }
  func.func @transform_0(%arg0: i32) -> (i32, i32) {
    %c0_i32 = arith.constant 0 : i32
    %c0_i32_0 = arith.constant 0 : i32
    return %arg0, %c0_i32 : i32, i32
  }
  func.func @transform_1(%arg0: i32) -> (i32, i32) {
    %c0_i32 = arith.constant 0 : i32
    %c0_i32_0 = arith.constant 0 : i32
    %c0_i32_1 = arith.constant 0 : i32
    return %c0_i32, %c0_i32_0 : i32, i32
  }
  func.func @transform_2(%arg0: i32) -> (i32, i32) {
    %c0_i32 = arith.constant 0 : i32
    %c0_i32_0 = arith.constant 0 : i32
    %c0_i32_1 = arith.constant 0 : i32
    return %c0_i32, %c0_i32_0 : i32, i32
  }
  func.func @transform_3(%arg0: i32) -> (i32, i32) {
    %c0_i32 = arith.constant 0 : i32
    %c0_i32_0 = arith.constant 0 : i32
    return %arg0, %c0_i32 : i32, i32
  }
  func.func @transform_4(%arg0: i32) -> (i32, i32) {
    %c0_i32 = arith.constant 0 : i32
    %c0_i32_0 = arith.constant 0 : i32
    return %arg0, %c0_i32 : i32, i32
  }
}

module attributes {stable_mosaic.version = 11 : i64} {
  func.func @_layernorm_kernel(%arg0: i32, %arg1: memref<16x32xf32, #tpu.memory_space<vmem>>, %arg2: memref<1x32xf32, #tpu.memory_space<vmem>>, %arg3: memref<1x32xf32, #tpu.memory_space<vmem>>, %arg4: memref<16x32xf32, #tpu.memory_space<vmem>>) attributes {dimension_semantics = [#tpu.dimension_semantics<parallel>], iteration_bounds = array<i64: 1>, scalar_prefetch = 0 : i64, scratch_operands = 0 : i64, tpu.core_type = #tpu.core_type<tc>, window_params = [{transform_indices = @transform_0, window_bounds = array<i64: 16, 32>}, {pipeline_mode = #tpu.pipeline_mode<synchronous>, transform_indices = @transform_1, window_bounds = array<i64: 1, 32>}, {pipeline_mode = #tpu.pipeline_mode<synchronous>, transform_indices = @transform_2, window_bounds = array<i64: 1, 32>}, {transform_indices = @transform_3, window_bounds = array<i64: 16, 32>}]} {
    %c0 = arith.constant 0 : index
    %c0_0 = arith.constant 0 : index
    %0 = vector.load %arg1[%c0, %c0_0] : memref<16x32xf32, #tpu.memory_space<vmem>>, vector<16x32xf32>
    %c0_1 = arith.constant 0 : index
    %c0_2 = arith.constant 0 : index
    %1 = vector.load %arg2[%c0_1, %c0_2] : memref<1x32xf32, #tpu.memory_space<vmem>>, vector<1x32xf32>
    %c0_3 = arith.constant 0 : index
    %c0_4 = arith.constant 0 : index
    %2 = vector.load %arg3[%c0_3, %c0_4] : memref<1x32xf32, #tpu.memory_space<vmem>>, vector<1x32xf32>
    %cst = arith.constant dense<0.000000e+00> : vector<16xf32>
    %3 = vector.multi_reduction <add>, %0, %cst [1] : vector<16x32xf32> to vector<16xf32>
    %4 = vector.shape_cast %3 : vector<16xf32> to vector<16x1xf32>
    %cst_5 = arith.constant 3.200000e+01 : f32
    %5 = vector.broadcast %cst_5 : f32 to vector<16x1xf32>
    %6 = arith.divf %4, %5 : vector<16x1xf32>
    %7 = vector.broadcast %6 : vector<16x1xf32> to vector<16x32xf32>
    %8 = arith.subf %0, %7 : vector<16x32xf32>
    %9 = arith.mulf %8, %8 : vector<16x32xf32>
    %cst_6 = arith.constant dense<0.000000e+00> : vector<16xf32>
    %10 = vector.multi_reduction <add>, %9, %cst_6 [1] : vector<16x32xf32> to vector<16xf32>
    %11 = vector.shape_cast %10 : vector<16xf32> to vector<16x1xf32>
    %cst_7 = arith.constant 0.0322580636 : f32
    %12 = vector.broadcast %cst_7 : f32 to vector<16x1xf32>
    %13 = arith.mulf %11, %12 : vector<16x1xf32>
    %14 = math.sqrt %13 : vector<16x1xf32>
    %cst_8 = arith.constant 9.99999997E-7 : f32
    %15 = vector.broadcast %cst_8 : f32 to vector<16x1xf32>
    %16 = arith.addf %14, %15 : vector<16x1xf32>
    %17 = tpu.reciprocal %16 {approx = true} : vector<16x1xf32> -> vector<16x1xf32>
    %18 = vector.broadcast %1 : vector<1x32xf32> to vector<16x32xf32>
    %19 = arith.mulf %18, %8 : vector<16x32xf32>
    %20 = vector.broadcast %17 : vector<16x1xf32> to vector<16x32xf32>
    %21 = arith.mulf %19, %20 : vector<16x32xf32>
    %22 = vector.broadcast %2 : vector<1x32xf32> to vector<16x32xf32>
    %23 = arith.addf %21, %22 : vector<16x32xf32>
    %c0_9 = arith.constant 0 : index
    %c0_10 = arith.constant 0 : index
    %24 = vector.load %arg4[%c0_9, %c0_10] : memref<16x32xf32, #tpu.memory_space<vmem>>, vector<16x32xf32>
    tpu.vector_store %arg4[%c0_9, %c0_10], %23 {strides = array<i32>} : memref<16x32xf32, #tpu.memory_space<vmem>>, vector<16x32xf32>,
    return
  }
  func.func @transform_0(%arg0: i32) -> (i32, i32) {
    %c0_i32 = arith.constant 0 : i32
    %c0_i32_0 = arith.constant 0 : i32
    return %arg0, %c0_i32 : i32, i32
  }
  func.func @transform_1(%arg0: i32) -> (i32, i32) {
    %c0_i32 = arith.constant 0 : i32
    %c0_i32_0 = arith.constant 0 : i32
    %c0_i32_1 = arith.constant 0 : i32
    return %c0_i32, %c0_i32_0 : i32, i32
  }
  func.func @transform_2(%arg0: i32) -> (i32, i32) {
    %c0_i32 = arith.constant 0 : i32
    %c0_i32_0 = arith.constant 0 : i32
    %c0_i32_1 = arith.constant 0 : i32
    return %c0_i32, %c0_i32_0 : i32, i32
  }
  func.func @transform_3(%arg0: i32) -> (i32, i32) {
    %c0_i32 = arith.constant 0 : i32
    %c0_i32_0 = arith.constant 0 : i32
    return %arg0, %c0_i32 : i32, i32
  }
}

</mosaic_0001>

<bundles_post_ra>
// kernel: _decoder_forward.17
= control target key start
LH: loop header
LB: loop body
LE: loop exit
PB: predicated region body
PF: predicated region fallthrough
CT: control target
= control target key end

     0   :  { %vm25_vm0 = vcmask 261120   ;;  %v172_v14 = vmov 0.0   ;;  %vm173_vm1 = vmmov 0   ;;  %s244_s0 = inlined_call_operand.vmem [shape: f32[16,32], index: 0, kind: input, shape index: {}]   ;;  %s245_s3 = inlined_call_operand.vmem [shape: f32[32,32], index: 3, kind: input, shape index: {}]   ;;  %s246_s1 = inlined_call_operand.vmem [shape: f32[1,32], index: 1, kind: input, shape index: {}]   ;;  %s247_s2 = inlined_call_operand.vmem [shape: f32[1,32], index: 2, kind: input, shape index: {}]   ;;  %s248_s4 = inlined_call_operand.vmem [shape: f32[1,32], index: 4, kind: input, shape index: {}]   ;;  %s249_s5 = inlined_call_operand.vmem [shape: f32[16,32], index: 5, kind: output, shape index: {}]  }
   0x1   :  { %v21_v0 = vld [vmem:[%s244_s0] sm:$0xff]  ;;  %v22_v1 = vld [vmem:[%s244_s0 + $0x8] sm:$0xff]  ;;  %154 = vmatprep.subr.bf16.mxu0 %v172_v14  ;;  %v86_v17 = vld [vmem:[%s245_s3 + $0x10] sm:$0xff]  ;;  %158 = vmatprep.mubr.msk.bf16.mxu0 %vm173_vm1, %v172_v14 }
   0x2   :  { %v26_v2 = vsel %vm25_vm0, %v21_v0, 0.0  ;;  %v29_v3 = vsel %vm25_vm0, %v22_v1, 0.0  ;;  %v84_v15 = vld [vmem:[%s245_s3] sm:$0xff]  ;;  %v85_v16 = vld [vmem:[%s245_s3 + $0x8] sm:$0xff]  ;;  %v87_v19 = vld [vmem:[%s245_s3 + $0x18] sm:$0xff] }
   0x3   :  { %27 = vadd.xlane.f32.xlu0 %v26_v2  ;;  %v88_v18 = vpack.c.bf16 %v85_v16, %v84_v15  ;;  %v89_v20 = vpack.c.bf16 %v87_v19, %v86_v17  ;;  %v147_v37 = vld [vmem:[%s246_s1] ss:$0 sm:$0xff] }
   0x4   :  { %v148_v43 = vld [vmem:[%s247_s2] ss:$0 sm:$0xff] }
   0x5   :  { %155 = vmatpush3.bf16.msra.mxu0 %v88_v18  ;;  %v149_v48 = vld [vmem:[%s248_s4] ss:$0 sm:$0xff] }
   0x6   :  { %156 = vmatprep.subr.bf16.mxu0 %v172_v14 }
   0x7   :  { %30 = vadd.xlane.f32.xlu0 %v29_v3 }
   0x9   :  { %157 = vmatpush3.bf16.msra.mxu0 %v89_v20 }
  0x90   :  { %v28_v4 = vpop.xlane.xlu0 %27 }
  0x91   :  { %v33_v5 = vmul.f32 0.03125, %v28_v4 }
  0x93   :  { %v35_v6 = vsub.f32 %v21_v0, %v33_v5 }
  0x94   :  { %v31_v7 = vpop.xlane.xlu0 %30 }
  0x95   :  { %v34_v8 = vmul.f32 0.03125, %v31_v7  ;;  %v37_v9 = vmul.f32 %v35_v6, %v35_v6  ;;  %v71_v39 = vmul.f32 %v147_v37, %v35_v6 }
  0x97   :  { %v36_v10 = vsub.f32 %v22_v1, %v34_v8  ;;  %v39_v11 = vsel %vm25_vm0, %v37_v9, 0.0 }
  0x98   :  { %40 = vadd.xlane.f32.xlu1 %v39_v11 }
  0x99   :  { %v38_v12 = vmul.f32 %v36_v10, %v36_v10  ;;  %v72_v40 = vmul.f32 %v147_v37, %v36_v10 }
  0x9b   :  { %v42_v13 = vsel %vm25_vm0, %v38_v12, 0.0 }
  0x9c   :  { %43 = vadd.xlane.f32.xlu1 %v42_v13 }
 0x125   :  { %v41_v21 = vpop.xlane.xlu1 %40 }
 0x126   :  { %v45_v22 = vmul.f32 0.032258064, %v41_v21 }
 0x128   :  { %164 = vrsqrt.f32 %v45_v22  ;;  %vm49_vm2 = vcmp.eq.f32.partialorder %v45_v22, inf  ;;  %v52_v27 = vand.u32 2147483648, %v45_v22  ;;  %vm51_vm3 = vcmp.eq.f32.partialorder %v45_v22, 0.0 }
 0x129   :  { %v44_v23 = vpop.xlane.xlu1 %43 }
 0x12a   :  { %v46_v24 = vmul.f32 0.032258064, %v44_v23 }
 0x12c   :  { %166 = vrsqrt.f32 %v46_v24  ;;  %vm56_vm4 = vcmp.eq.f32.partialorder %v46_v24, inf  ;;  %v59_v33 = vand.u32 2147483648, %v46_v24  ;;  %vm58_vm5 = vcmp.eq.f32.partialorder %v46_v24, 0.0 }
 0x132   :  { %v165_v25 = vpop.eup %164 }
 0x133   :  { %v48_v26 = vmul.f32 %v165_v25, %v45_v22 }
 0x135   :  { %v50_v28 = vsel %vm49_vm2, %v45_v22, %v48_v26 }
 0x136   :  { %v167_v29 = vpop.eup %166  ;;  %v53_v30 = vsel %vm51_vm3, %v52_v27, %v50_v28 }
 0x137   :  { %v61_v31 = vadd.f32 1e-06, %v53_v30  ;;  %v55_v32 = vmul.f32 %v167_v29, %v46_v24 }
 0x139   :  { %168 = vrcp.f32 %v61_v31  ;;  %v57_v34 = vsel %vm56_vm4, %v46_v24, %v55_v32 }
 0x13a   :  { %v60_v35 = vsel %vm58_vm5, %v59_v33, %v57_v34 }
 0x13b   :  { %v62_v36 = vadd.f32 1e-06, %v60_v35 }
 0x13d   :  { %170 = vrcp.f32 %v62_v36 }
 0x143   :  { %v169_v38 = vpop.eup %168 }
 0x144   :  { %v73_v41 = vmul.f32 %v169_v38, %v71_v39 }
 0x146   :  { %v81_v45 = vadd.f32 %v148_v43, %v73_v41 }
 0x147   :  { %v171_v42 = vpop.eup %170 }
 0x148   :  { %v74_v44 = vmul.f32 %v171_v42, %v72_v40 }
 0x14a   :  { %v82_v46 = vadd.f32 %v148_v43, %v74_v44 }
 0x14c   :  { %v83_v47 = vpack.c.bf16 %v82_v46, %v81_v45 }
 0x14e   :  { %159 = vmatmul.mubr.msk.bf16.vlgmr.msra.gmra.mrb[0].mxu0 %vm25_vm0, %v83_v47 }
 0x221   :  { %v134_v49 = vpop.f32.mrb[0].mxu0 }
 0x222   :  { %v135_v50 = vadd.f32 %v149_v48, %v134_v49  ;;  %v160_v51 = vpop.f32.mrb[1].mxu0 }
 0x223   :  { %v137_v52 = vpop.f32.mrb[2].mxu0 }
 0x224   :  { %141 = vst.msk [vmem:[%s249_s5] sm:$0xff] %vm25_vm0, %v135_v50  ;;  %v138_v53 = vadd.f32 %v149_v48, %v137_v52  ;;  %v161_v54 = vpop.f32.mrb[3].mxu0 }
 0x226   :  { %142 = vst.msk [vmem:[%s249_s5 + $0x8] sm:$0xff] %vm25_vm0, %v138_v53 }

// kernel: _decoder_forward.18
= control target key start
LH: loop header
LB: loop body
LE: loop exit
PB: predicated region body
PF: predicated region fallthrough
CT: control target
= control target key end

     0   :  { %v98_v0 = vmov 0.0   ;;  %vm99_vm0 = vmmov 0   ;;  %vm31_vm1 = vcmask 261120   ;;  %vm76_vm2 = vcmask 523264   ;;  %s147_s1 = inlined_call_operand.vmem [shape: f32[32,64], index: 1, kind: input, shape index: {}]   ;;  %s148_s0 = inlined_call_operand.vmem [shape: f32[16,32], index: 0, kind: input, shape index: {}]   ;;  %s149_s2 = inlined_call_operand.vmem [shape: f32[1,64], index: 2, kind: input, shape index: {}]   ;;  %s150_s3 = inlined_call_operand.vmem [shape: f32[16,64], index: 3, kind: output, shape index: {}]  }
   0x1   :  { %88 = vmatprep.subr.bf16.mxu0 %v98_v0  ;;  %v18_v1 = vld [vmem:[%s147_s1] sm:$0xff]  ;;  %v19_v2 = vld [vmem:[%s147_s1 + $0x8] sm:$0xff]  ;;  %v20_v3 = vld [vmem:[%s147_s1 + $0x10] sm:$0xff]  ;;  %92 = vmatprep.mubr.msk.bf16.mxu0 %vm99_vm0, %v98_v0 }
   0x2   :  { %v22_v4 = vpack.c.bf16 %v19_v2, %v18_v1  ;;  %v21_v5 = vld [vmem:[%s147_s1 + $0x18] sm:$0xff]  ;;  %v15_v7 = vld [vmem:[%s148_s0] sm:$0xff]  ;;  %v16_v8 = vld [vmem:[%s148_s0 + $0x8] sm:$0xff] }
   0x3   :  { %v23_v6 = vpack.c.bf16 %v21_v5, %v20_v3  ;;  %v17_v9 = vpack.c.bf16 %v16_v8, %v15_v7  ;;  %v83_v10 = vld [vmem:[%s149_s2] ss:$0 sm:$0xff] }
   0x4   :  { %89 = vmatpush3.bf16.msra.mxu0 %v22_v4 }
   0x5   :  { %90 = vmatprep.subr.bf16.mxu0 %v98_v0 }
   0x8   :  { %91 = vmatpush3.bf16.msra.mxu0 %v23_v6 }
   0xb   :  { %93 = vmatmul.mubr.msk.bf16.vlgmr.msra.gmra.mrb[0].mxu0 %vm31_vm1, %v17_v9 }
  0xde   :  { %v69_v11 = vpop.f32.mrb[0].mxu0 }
  0xdf   :  { %v70_v12 = vadd.f32 %v83_v10, %v69_v11  ;;  %v94_v13 = vpop.f32.mrb[1].mxu0 }
  0xe0   :  { %v72_v14 = vpop.f32.mrb[2].mxu0 }
  0xe1   :  { %77 = vst.msk [vmem:[%s150_s3] sm:$0xff] %vm76_vm2, %v70_v12  ;;  %v73_v15 = vadd.f32 %v83_v10, %v72_v14  ;;  %v95_v16 = vpop.f32.mrb[3].mxu0 }
  0xe3   :  { %78 = vst.msk [vmem:[%s150_s3 + $0x8] sm:$0xff] %vm76_vm2, %v73_v15 }

// kernel: _decoder_forward.15
= control target key start
LH: loop header
LB: loop body
LE: loop exit
PB: predicated region body
PF: predicated region fallthrough
CT: control target
= control target key end

     0   :  { %vm25_vm0 = vcmask 261120   ;;  %v173_v14 = vmov 0.0   ;;  %vm174_vm1 = vmmov 0   ;;  %vm141_vm6 = vcmask 785408   ;;  %s243_s0 = inlined_call_operand.vmem [shape: f32[16,32], index: 0, kind: input, shape index: {}]   ;;  %s244_s3 = inlined_call_operand.vmem [shape: f32[32,96], index: 3, kind: input, shape index: {}]   ;;  %s245_s1 = inlined_call_operand.vmem [shape: f32[1,32], index: 1, kind: input, shape index: {}]   ;;  %s246_s2 = inlined_call_operand.vmem [shape: f32[1,32], index: 2, kind: input, shape index: {}]   ;;  %s247_s4 = inlined_call_operand.vmem [shape: f32[1,96], index: 4, kind: input, shape index: {}]   ;;  %s248_s5 = inlined_call_operand.vmem [shape: f32[16,96], index: 5, kind: output, shape index: {}]  }
   0x1   :  { %v21_v0 = vld [vmem:[%s243_s0] sm:$0xff]  ;;  %v22_v1 = vld [vmem:[%s243_s0 + $0x8] sm:$0xff]  ;;  %155 = vmatprep.subr.bf16.mxu0 %v173_v14  ;;  %v86_v17 = vld [vmem:[%s244_s3 + $0x10] sm:$0xff]  ;;  %159 = vmatprep.mubr.msk.bf16.mxu0 %vm174_vm1, %v173_v14 }
   0x2   :  { %v26_v2 = vsel %vm25_vm0, %v21_v0, 0.0  ;;  %v29_v3 = vsel %vm25_vm0, %v22_v1, 0.0  ;;  %v84_v15 = vld [vmem:[%s244_s3] sm:$0xff]  ;;  %v85_v16 = vld [vmem:[%s244_s3 + $0x8] sm:$0xff]  ;;  %v87_v19 = vld [vmem:[%s244_s3 + $0x18] sm:$0xff] }
   0x3   :  { %27 = vadd.xlane.f32.xlu0 %v26_v2  ;;  %v88_v18 = vpack.c.bf16 %v85_v16, %v84_v15  ;;  %v89_v20 = vpack.c.bf16 %v87_v19, %v86_v17  ;;  %v148_v37 = vld [vmem:[%s245_s1] ss:$0 sm:$0xff] }
   0x4   :  { %v149_v43 = vld [vmem:[%s246_s2] ss:$0 sm:$0xff] }
   0x5   :  { %156 = vmatpush3.bf16.msra.mxu0 %v88_v18  ;;  %v150_v48 = vld [vmem:[%s247_s4] ss:$0 sm:$0xff] }
   0x6   :  { %157 = vmatprep.subr.bf16.mxu0 %v173_v14 }
   0x7   :  { %30 = vadd.xlane.f32.xlu0 %v29_v3 }
   0x9   :  { %158 = vmatpush3.bf16.msra.mxu0 %v89_v20 }
  0x90   :  { %v28_v4 = vpop.xlane.xlu0 %27 }
  0x91   :  { %v33_v5 = vmul.f32 0.03125, %v28_v4 }
  0x93   :  { %v35_v6 = vsub.f32 %v21_v0, %v33_v5 }
  0x94   :  { %v31_v7 = vpop.xlane.xlu0 %30 }
  0x95   :  { %v34_v8 = vmul.f32 0.03125, %v31_v7  ;;  %v37_v9 = vmul.f32 %v35_v6, %v35_v6  ;;  %v71_v39 = vmul.f32 %v148_v37, %v35_v6 }
  0x97   :  { %v36_v10 = vsub.f32 %v22_v1, %v34_v8  ;;  %v39_v11 = vsel %vm25_vm0, %v37_v9, 0.0 }
  0x98   :  { %40 = vadd.xlane.f32.xlu1 %v39_v11 }
  0x99   :  { %v38_v12 = vmul.f32 %v36_v10, %v36_v10  ;;  %v72_v40 = vmul.f32 %v148_v37, %v36_v10 }
  0x9b   :  { %v42_v13 = vsel %vm25_vm0, %v38_v12, 0.0 }
  0x9c   :  { %43 = vadd.xlane.f32.xlu1 %v42_v13 }
 0x125   :  { %v41_v21 = vpop.xlane.xlu1 %40 }
 0x126   :  { %v45_v22 = vmul.f32 0.032258064, %v41_v21 }
 0x128   :  { %165 = vrsqrt.f32 %v45_v22  ;;  %vm49_vm2 = vcmp.eq.f32.partialorder %v45_v22, inf  ;;  %v52_v27 = vand.u32 2147483648, %v45_v22  ;;  %vm51_vm3 = vcmp.eq.f32.partialorder %v45_v22, 0.0 }
 0x129   :  { %v44_v23 = vpop.xlane.xlu1 %43 }
 0x12a   :  { %v46_v24 = vmul.f32 0.032258064, %v44_v23 }
 0x12c   :  { %167 = vrsqrt.f32 %v46_v24  ;;  %vm56_vm4 = vcmp.eq.f32.partialorder %v46_v24, inf  ;;  %v59_v33 = vand.u32 2147483648, %v46_v24  ;;  %vm58_vm5 = vcmp.eq.f32.partialorder %v46_v24, 0.0 }
 0x132   :  { %v166_v25 = vpop.eup %165 }
 0x133   :  { %v48_v26 = vmul.f32 %v166_v25, %v45_v22 }
 0x135   :  { %v50_v28 = vsel %vm49_vm2, %v45_v22, %v48_v26 }
 0x136   :  { %v168_v29 = vpop.eup %167  ;;  %v53_v30 = vsel %vm51_vm3, %v52_v27, %v50_v28 }
 0x137   :  { %v61_v31 = vadd.f32 1e-06, %v53_v30  ;;  %v55_v32 = vmul.f32 %v168_v29, %v46_v24 }
 0x139   :  { %169 = vrcp.f32 %v61_v31  ;;  %v57_v34 = vsel %vm56_vm4, %v46_v24, %v55_v32 }
 0x13a   :  { %v60_v35 = vsel %vm58_vm5, %v59_v33, %v57_v34 }
 0x13b   :  { %v62_v36 = vadd.f32 1e-06, %v60_v35 }
 0x13d   :  { %171 = vrcp.f32 %v62_v36 }
 0x143   :  { %v170_v38 = vpop.eup %169 }
 0x144   :  { %v73_v41 = vmul.f32 %v170_v38, %v71_v39 }
 0x146   :  { %v81_v45 = vadd.f32 %v149_v43, %v73_v41 }
 0x147   :  { %v172_v42 = vpop.eup %171 }
 0x148   :  { %v74_v44 = vmul.f32 %v172_v42, %v72_v40 }
 0x14a   :  { %v82_v46 = vadd.f32 %v149_v43, %v74_v44 }
 0x14c   :  { %v83_v47 = vpack.c.bf16 %v82_v46, %v81_v45 }
 0x14e   :  { %160 = vmatmul.mubr.msk.bf16.vlgmr.msra.gmra.mrb[0].mxu0 %vm25_vm0, %v83_v47 }
 0x221   :  { %v134_v49 = vpop.f32.mrb[0].mxu0 }
 0x222   :  { %v135_v50 = vadd.f32 %v150_v48, %v134_v49  ;;  %v161_v51 = vpop.f32.mrb[1].mxu0 }
 0x223   :  { %v137_v52 = vpop.f32.mrb[2].mxu0 }
 0x224   :  { %142 = vst.msk [vmem:[%s248_s5] sm:$0xff] %vm141_vm6, %v135_v50  ;;  %v138_v53 = vadd.f32 %v150_v48, %v137_v52  ;;  %v162_v54 = vpop.f32.mrb[3].mxu0 }
 0x226   :  { %143 = vst.msk [vmem:[%s248_s5 + $0x8] sm:$0xff] %vm141_vm6, %v138_v53 }

// kernel: _decoder_forward.16
= control target key start
LH: loop header
LB: loop body
LE: loop exit
PB: predicated region body
PF: predicated region fallthrough
CT: control target
= control target key end

     0   :  { %s1052_s18 = smov 0   ;;  %s1173_s0 = inlined_call_operand.vmem [shape: f32[2,8,96], index: 0, kind: input, shape index: {}]   ;;  %s1174_s1 = inlined_call_operand.vmem [shape: f32[2,8,8], index: 1, kind: input, shape index: {}]   ;;  %s1175_s2 = inlined_call_operand.vmem [shape: f32[32,32], index: 2, kind: input, shape index: {}]   ;;  %s1176_s3 = inlined_call_operand.vmem [shape: f32[1,32], index: 3, kind: input, shape index: {}]   ;;  %s1177_s4 = inlined_call_operand.vmem [shape: f32[2,8,32], index: 4, kind: input, shape index: {}]   ;;  %s1178_s5 = inlined_call_operand.vmem [shape: f32[2,8,32], index: 5, kind: output, shape index: {}]  }
   0x1 LB: > { %s862_s19 = sadd.s32 4294967295, %s1004_s18   ;;  %p866_p0 = scmp.ge.s32.totalorder %s1004_s18, 1  ;;  %s1004_s18 = sphi %s1052_s18, %s15_s18  }
   0x2   : > { %p204_p1 = scmp.lt.s32.totalorder %s1004_s18, 3 }
   0x4   : > { %p205_p2 = pnand %p866_p0, %p204_p1 }
   0x5   : > { %p238_p3 = scmp.lt.s32.totalorder (!%p205_p2), %s862_s19, 1  ;;  %v1006_v0 = vmov (!%p205_p2), 0.0   ;;  %vm1007_vm0 = vmmov (!%p205_p2), 0   ;;  %s1008_s24 = smov (!%p205_p2), 96   ;;  %vm263_vm1 = vcmask (!%p205_p2), 64512   ;;  %vm329_vm3 = vcmask (!%p205_p2), 1043456  }
   0x6   : > { %208 = sbr.rel (%p205_p2) target bundleno = 1816 (0x718), region = 40  ;;  %902 = vmatprep.subr.bf16.mxu0 (!%p205_p2), %v1006_v0  ;;  %904 = vmatprep.mubr.msk.bf16.mxu0 (!%p205_p2), %vm1007_vm0, %v1006_v0  ;;  %s1009_s25 = smov (!%p205_p2), 64   ;;  %vm720_vm4 = vcmask (!%p205_p2), 130048   ;;  %vm722_vm5 = vcmask (!%p205_p2), 195584   ;;  %vm738_vm6 = vcmask (!%p205_p2), 261120  }
   0x7   : > { %908 = vmatprep.subr.bf16.mxu1 (!%p205_p2), %v1006_v0  ;;  %910 = vmatprep.mubr.msk.bf16.mxu1 (!%p205_p2), %vm1007_vm0, %v1006_v0  ;;  %s1010_s26 = smov (!%p205_p2), 88   ;;  %s1011_s30 = smov (!%p205_p2), 72  }
   0x8   : > { %s1012_s6 = smov (!%p205_p2), 120   ;;  %s1013_s7 = smov (!%p205_p2), 80  }
   0x9   : > { %s1014_s8 = smov (!%p205_p2), 112   ;;  %s1015_s9 = smov (!%p205_p2), 104  }
   0xa   : > { %s1016_s10 = smov (!%p205_p2), 56   ;;  %s1017_s11 = smov (!%p205_p2), 48  }
   0xb   : > { %s1018_s12 = smov (!%p205_p2), 40   ;;  %s1019_s13 = smov (!%p205_p2), 8  }
   0xd   : > { %s1180_s19 = smov (!%p238_p3, %s862_s19), 1 }
   0xe   : > { %s1066_s20 = sshll.u32 %s1180_s19, 3 }
   0xf   : > { %s241_s23 = scalar_lea.vmem %s1173_s0, %s1066_s20  ;;  %s245_s29 = scalar_lea.vmem %s1174_s1, %s1066_s20 }
  0x10   : > { %v255_v1 = vld [vmem:[%s241_s23] sm:$0xff]  ;;  %s249_s28 = scalar_lea.vmem %s1177_s4, %s1066_s20 }
  0x11   : > { %v1072_v2 = vpack.c.bf16 %v255_v1, %v255_v1  ;;  %v257_v5 = vmul.f32 0.35355338, %v255_v1  ;;  %v1086_v7 = vld [vmem:[%s245_s29] sm:$0xff] }
  0x12   : > { %vm310_vm2 = vcmp.gt.f32.partialorder %v1086_v7, 0.0 }
  0x13   : > { %261 = vrot.lane.b32.xlu0 %v1072_v2, %s1008_s24  ;;  %v258_v6 = vpack.c.bf16 %v257_v5, %v257_v5  ;;  %324 = vrot.lane.b32.xlu1 %v1072_v2, %s1009_s25  ;;  %s1020_s24 = smov 16   ;;  %s1021_s25 = smov 24  }
  0x17   : > { %376 = vrot.lane.b32.xlu1 %v1072_v2, %s1010_s26 }
  0x85   : > { %v262_v3 = vpop.permute.xlu0 %261  ;;  %v325_v14 = vpop.permute.xlu1 %324 }
  0x86   : > { %v268_v4 = vsel %vm263_vm1, %v262_v3, 0  ;;  %v331_v15 = vsel %vm329_vm3, %v325_v14, 0 }
  0x87   : > { %903 = vmatpush3.bf16.xpose.msra.mxu0 %v268_v4  ;;  %909 = vmatpush3.bf16.msra.mxu1 %v331_v15 }
  0x88   : > { %920 = vmatprep.subr.bf16.mxu0 %v1006_v0  ;;  %914 = vmatprep.subr.bf16.mxu1 %v1006_v0 }
  0x89   : > { %v377_v21 = vpop.permute.xlu1 %376 }
  0x8a   : > { %v382_v27 = vsel %vm263_vm1, %v377_v21, 0 }
  0x8e   : > { %905 = vmatmul.mubr.msk.bf16.vlgmr.msra.gmra.mrb[0].mxu0 %vm263_vm1, %v258_v6 }
  0x8f   : > { %922 = vmatprep.mubr.msk.bf16.mxu0 %vm1007_vm0, %v1006_v0 }
 0x161   : > { %v304_v8 = vpop.f32.mrb[0].mxu0 }
 0x162   : > { %v311_v9 = vsel %vm310_vm2, %v304_v8, -1e+09  ;;  %v906_v10 = vpop.f32.mrb[1].mxu0 }
 0x163   : > { %v307_v11 = vpop.f32.mrb[2].mxu0  ;;  %v312_v12 = vsel %vm263_vm1, %v311_v9, -inf }
 0x164   : > { %313 = vmax.xlane.f32.xlu0 %v312_v12  ;;  %v907_v13 = vpop.f32.mrb[3].mxu0 }
 0x17a   : > { %598 = vrot.lane.b32.xlu0 %v1072_v2, %s1011_s30 }
 0x1f1   : > { %v314_v16 = vpop.xlane.xlu0 %313 }
 0x1f2   : > { %v315_v17 = vsub.f32 %v311_v9, %v314_v16 }
 0x1f4   : > { %v316_v18 = vmul.f32 1.442695, %v315_v17 }
 0x1f5   : > { %v599_v30 = vpop.permute.xlu0 %598 }
 0x1f6   : > { %982 = vpow2.f32 %v316_v18  ;;  %v604_v32 = vsel %vm263_vm1, %v599_v30, 0  ;;  %v725_v30 = vld [vmem:[%s1175_s2] sm:$0xff] }
 0x200   : > { %v983_v19 = vpop.eup %982 }
 0x201   : > { %v318_v20 = vsel %vm263_vm1, %v983_v19, 0.0 }
 0x202   : > { %319 = vadd.xlane.f32.xlu1 %v318_v20 }
 0x213   : > { %374 = vrot.lane.b32.xlu1 %v258_v6, %s1012_s6 }
 0x217   : > { %487 = vrot.lane.b32.xlu1 %v1072_v2, %s1013_s7 }
 0x21b   : > { %485 = vrot.lane.b32.xlu1 %v258_v6, %s1014_s8  ;;  %s253_s8 = scalar_lea.vmem %s1178_s5, %s1066_s20 }
 0x21f   : > { %596 = vrot.lane.b32.xlu1 %v258_v6, %s1015_s9 }
 0x28f   : > { %v320_v22 = vpop.xlane.xlu1 %319 }
 0x290   : > { %984 = vrcp.f32 %v320_v22 }
 0x293   : > { %v375_v25 = vpop.permute.xlu1 %374 }
 0x297   : > { %v488_v28 = vpop.permute.xlu1 %487 }
 0x298   : > { %v493_v29 = vsel %vm263_vm1, %v488_v28, 0 }
 0x29a   : > { %v985_v23 = vpop.eup %984 }
 0x29b   : > { %v322_v24 = vmul.f32 %v985_v23, %v983_v19  ;;  %v486_v31 = vpop.permute.xlu1 %485 }
 0x29d   : > { %v323_v26 = vpack.c.bf16 %v322_v24, %v322_v24 }
 0x29f   : > { %911 = vmatmul.mubr.msk.bf16.vlgmr.msra.gmra.mrb[0].mxu1 %vm263_vm1, %v323_v26  ;;  %v597_v33 = vpop.permute.xlu1 %596 }
 0x2a0   : > { %915 = vmatpush3.bf16.xpose.msra.mxu1 %v382_v27  ;;  %916 = vmatprep.mubr.msk.bf16.mxu1 %vm1007_vm0, %v1006_v0 }
 0x2a1   : > { %926 = vmatprep.subr.bf16.mxu1 %v1006_v0 }
 0x2a7   : > { %917 = vmatmul.mubr.msk.bf16.vlgmr.msra.gmra.mrb[4].mxu1 %vm263_vm1, %v375_v25 }
 0x2a8   : > { %927 = vmatpush3.bf16.xpose.msra.mxu1 %v493_v29  ;;  %928 = vmatprep.mubr.msk.bf16.mxu1 %vm1007_vm0, %v1006_v0 }
 0x2a9   : > { %938 = vmatprep.subr.bf16.mxu1 %v1006_v0 }
 0x2af   : > { %929 = vmatmul.mubr.msk.bf16.vlgmr.msra.gmra.mrb[8].mxu1 %vm263_vm1, %v486_v31  ;;  %v726_v31 = vld [vmem:[%s1175_s2 + $0x8] sm:$0xff] }
 0x2b0   : > { %939 = vmatpush3.bf16.xpose.msra.mxu1 %v604_v32  ;;  %940 = vmatprep.mubr.msk.bf16.mxu1 %vm1007_vm0, %v1006_v0  ;;  %v727_v32 = vld [vmem:[%s1175_s2 + $0x10] sm:$0xff] }
 0x2b1   : > { %950 = vmatprep.subr.bf16.mxu1 %v1006_v0 }
 0x2b7   : > { %941 = vmatmul.mubr.msk.bf16.vlgmr.msra.gmra.mrb[12].mxu1 %vm263_vm1, %v597_v33  ;;  %v729_v33 = vpack.c.bf16 %v726_v31, %v725_v30 }
 0x2b8   : > { %954 = vmatprep.mubr.msk.bf16.mxu1 %vm1007_vm0, %v1006_v0 }
 0x2b9   : > { %951 = vmatpush3.bf16.msra.mxu1 %v729_v33 }
 0x2ba   : > { %952 = vmatprep.subr.bf16.mxu1 %v1006_v0 }
 0x372   : > { %v1115_v34 = vpop.f32.mrb[0].mxu1 }
 0x373   : > { %v912_v35 = vpop.f32.mrb[1].mxu1 }
 0x374   : > { %v370_v36 = vpop.f32.mrb[2].mxu1  ;;  %v728_v35 = vld [vmem:[%s1175_s2 + $0x18] sm:$0xff] }
 0x375   : > { %v913_v37 = vpop.f32.mrb[3].mxu1  ;;  %v730_v36 = vpack.c.bf16 %v728_v35, %v727_v32 }
 0x377   : > { %953 = vmatpush3.bf16.msra.mxu1 %v730_v36 }
 0x37a   : > { %v418_v38 = vpop.f32.mrb[4].mxu1 }
 0x37b   : > { %v424_v39 = vsel %vm310_vm2, %v418_v38, -1e+09  ;;  %v918_v40 = vpop.f32.mrb[5].mxu1 }
 0x37c   : > { %v421_v41 = vpop.f32.mrb[6].mxu1  ;;  %v425_v42 = vsel %vm263_vm1, %v424_v39, -inf }
 0x37d   : > { %426 = vmax.xlane.f32.xlu1 %v425_v42  ;;  %v919_v43 = vpop.f32.mrb[7].mxu1 }
 0x382   : > { %v529_v44 = vpop.f32.mrb[8].mxu1 }
 0x383   : > { %v535_v45 = vsel %vm310_vm2, %v529_v44, -1e+09  ;;  %v930_v46 = vpop.f32.mrb[9].mxu1 }
 0x384   : > { %v536_v47 = vsel %vm263_vm1, %v535_v45, -inf  ;;  %v532_v48 = vpop.f32.mrb[10].mxu1 }
 0x385   : > { %537 = vmax.xlane.f32.xlu0 %v536_v47  ;;  %v931_v49 = vpop.f32.mrb[11].mxu1 }
 0x38a   : > { %v640_v50 = vpop.f32.mrb[12].mxu1 }
 0x38b   : > { %v646_v51 = vsel %vm310_vm2, %v640_v50, -1e+09  ;;  %v942_v52 = vpop.f32.mrb[13].mxu1 }
 0x38c   : > { %v647_v53 = vsel %vm263_vm1, %v646_v51, -inf  ;;  %v643_v54 = vpop.f32.mrb[14].mxu1 }
 0x38d   : > { %648 = vmax.xlane.f32.xlu1 %v647_v53  ;;  %v943_v55 = vpop.f32.mrb[15].mxu1  ;;  %v782_v53 = vld [vmem:[%s249_s28] sm:$0xff] }
 0x40a   : > { %v427_v56 = vpop.xlane.xlu1 %426 }
 0x40b   : > { %v428_v57 = vsub.f32 %v424_v39, %v427_v56 }
 0x40d   : > { %v429_v58 = vmul.f32 1.442695, %v428_v57 }
 0x40f   : > { %986 = vpow2.f32 %v429_v58 }
 0x412   : > { %v538_v4 = vpop.xlane.xlu0 %537 }
 0x413   : > { %v539_v5 = vsub.f32 %v535_v45, %v538_v4 }
 0x415   : > { %v540_v6 = vmul.f32 1.442695, %v539_v5 }
 0x419   : > { %v987_v59 = vpop.eup %986 }
 0x41a   : > { %v649_v60 = vpop.xlane.xlu1 %648  ;;  %v431_v61 = vsel %vm263_vm1, %v987_v59, 0.0 }
 0x41b   : > { %v650_v62 = vsub.f32 %v646_v51, %v649_v60  ;;  %432 = vadd.xlane.f32.xlu1 %v431_v61  ;;  %v879_v51 = vld [vmem:[%s1176_s3] ss:$0 sm:$0xff] }
 0x41d   : > { %v651_v63 = vmul.f32 1.442695, %v650_v62 }
 0x41f   : > { %988 = vpow2.f32 %v651_v63 }
 0x420   : > { %990 = vpow2.f32 %v540_v6 }
 0x429   : > { %v989_v1 = vpop.eup %988 }
 0x42a   : > { %v653_v3 = vsel %vm263_vm1, %v989_v1, 0.0  ;;  %v991_v7 = vpop.eup %990 }
 0x42b   : > { %654 = vadd.xlane.f32.xlu0 %v653_v3  ;;  %v542_v8 = vsel %vm263_vm1, %v991_v7, 0.0 }
 0x42c   : > { %437 = vrot.lane.b32.xlu1 %v1072_v2, %s1016_s10 }
 0x441   : > { %548 = vrot.lane.b32.xlu0 %v1072_v2, %s1017_s11 }
 0x450   : > { %543 = vadd.xlane.f32.xlu1 %v542_v8 }
 0x461   : > { %659 = vrot.lane.b32.xlu1 %v1072_v2, %s1018_s12 }
 0x4a8   : > { %v433_v9 = vpop.xlane.xlu1 %432 }
 0x4a9   : > { %992 = vrcp.f32 %v433_v9 }
 0x4ac   : > { %v438_v10 = vpop.permute.xlu1 %437 }
 0x4ad   : > { %v443_v11 = vsel %vm329_vm3, %v438_v10, 0 }
 0x4ae   : > { %921 = vmatpush3.bf16.msra.mxu0 %v443_v11 }
 0x4af   : > { %932 = vmatprep.subr.bf16.mxu0 %v1006_v0 }
 0x4b3   : > { %v993_v12 = vpop.eup %992 }
 0x4b4   : > { %v435_v13 = vmul.f32 %v993_v12, %v987_v59 }
 0x4b6   : > { %v436_v14 = vpack.c.bf16 %v435_v13, %v435_v13 }
 0x4b8   : > { %923 = vmatmul.mubr.msk.bf16.vlgmr.msra.gmra.mrb[4].mxu0 %vm263_vm1, %v436_v14  ;;  %v655_v15 = vpop.xlane.xlu0 %654 }
 0x4b9   : > { %934 = vmatprep.mubr.msk.bf16.mxu0 %vm1007_vm0, %v1006_v0 }
 0x4bc   : > { %v549_v16 = vpop.permute.xlu0 %548 }
 0x4bd   : > { %v554_v2 = vsel %vm329_vm3, %v549_v16, 0 }
 0x4be   : > { %933 = vmatpush3.bf16.msra.mxu0 %v554_v2 }
 0x4bf   : > { %944 = vmatprep.subr.bf16.mxu0 %v1006_v0 }
 0x4dd   : > { %v544_v17 = vpop.xlane.xlu1 %543 }
 0x4de   : > { %994 = vrcp.f32 %v544_v17 }
 0x4df   : > { %996 = vrcp.f32 %v655_v15 }
 0x4e1   : > { %v660_v19 = vpop.permute.xlu1 %659 }
 0x4e2   : > { %v665_v21 = vsel %vm329_vm3, %v660_v19, 0 }
 0x4e8   : > { %v995_v18 = vpop.eup %994 }
 0x4e9   : > { %v546_v20 = vmul.f32 %v995_v18, %v991_v7  ;;  %v997_v23 = vpop.eup %996 }
 0x4ea   : > { %v657_v24 = vmul.f32 %v997_v23, %v989_v1 }
 0x4eb   : > { %v547_v22 = vpack.c.bf16 %v546_v20, %v546_v20 }
 0x4ec   : > { %v658_v25 = vpack.c.bf16 %v657_v24, %v657_v24 }
 0x4ed   : > { %935 = vmatmul.mubr.msk.bf16.vlgmr.msra.gmra.mrb[8].mxu0 %vm263_vm1, %v547_v22 }
 0x4ee   : > { %945 = vmatpush3.bf16.msra.mxu0 %v665_v21  ;;  %946 = vmatprep.mubr.msk.bf16.mxu0 %vm1007_vm0, %v1006_v0 }
 0x4f5   : > { %947 = vmatmul.mubr.msk.bf16.vlgmr.msra.gmra.mrb[12].mxu0 %vm263_vm1, %v658_v25 }
 0x58b   : > { %v479_v26 = vpop.f32.mrb[4].mxu0 }
 0x58c   : > { %708 = vrot.lane.b32.xlu1 %v479_v26, %s1019_s13  ;;  %v924_v27 = vpop.f32.mrb[5].mxu0 }
 0x58d   : > { %v482_v28 = vpop.f32.mrb[6].mxu0 }
 0x58e   : > { %v925_v29 = vpop.f32.mrb[7].mxu0 }
 0x5c0   : > { %v590_v37 = vpop.f32.mrb[8].mxu0 }
 0x5c1   : > { %712 = vrot.lane.b32.xlu0 %v590_v37, %s1020_s24  ;;  %v936_v38 = vpop.f32.mrb[9].mxu0 }
 0x5c2   : > { %v593_v39 = vpop.f32.mrb[10].mxu0 }
 0x5c3   : > { %v937_v40 = vpop.f32.mrb[11].mxu0 }
 0x5c8   : > { %v701_v41 = vpop.f32.mrb[12].mxu0 }
 0x5c9   : > { %716 = vrot.lane.b32.xlu1 %v701_v41, %s1021_s25  ;;  %v948_v42 = vpop.f32.mrb[13].mxu0 }
 0x5ca   : > { %v704_v43 = vpop.f32.mrb[14].mxu0 }
 0x5cb   : > { %v949_v44 = vpop.f32.mrb[15].mxu0 }
 0x5fe   : > { %v709_v45 = vpop.permute.xlu1 %708 }
 0x5ff   : > { %v719_v0 = vsel %vm263_vm1, %v1115_v34, %v709_v45 }
 0x633   : > { %v713_v46 = vpop.permute.xlu0 %712 }
 0x634   : > { %v721_v47 = vsel %vm720_vm4, %v719_v0, %v713_v46 }
 0x63b   : > { %v717_v48 = vpop.permute.xlu1 %716 }
 0x63c   : > { %v723_v49 = vsel %vm722_vm5, %v721_v47, %v717_v48 }
 0x63d   : > { %v724_v50 = vpack.c.bf16 %v723_v49, %v723_v49 }
 0x63f   : > { %955 = vmatmul.mubr.msk.bf16.vlgmr.msra.gmra.mrb[16].mxu1 %vm738_vm6, %v724_v50 }
 0x712   : > { %v776_v52 = vpop.f32.mrb[16].mxu1 }
 0x713   : > { %v777_v54 = vadd.f32 %v879_v51, %v776_v52  ;;  %v956_v55 = vpop.f32.mrb[17].mxu1 }
 0x714   : > { %v779_v34 = vpop.f32.mrb[18].mxu1 }
 0x715   : > { %v783_v56 = vadd.f32 %v782_v53, %v777_v54  ;;  %v957_v57 = vpop.f32.mrb[19].mxu1 }
 0x717   : > { %784 = vst.msk [vmem:[%s253_s8] sm:$0xff] %vm738_vm6, %v783_v56 }
 0x718 PF: > { %s15_s18 = sadd.s32 1, %s1004_s18  }
 0x719   : > { %p12_p4 = scmp.ge.s32.totalorder %s15_s18, 4  }
 0x71b   :  { %14 = sbr.rel (!%p12_p4) target bundleno = 1 (0x1), region = 76 }

// kernel: _decoder_forward.20
= control target key start
LH: loop header
LB: loop body
LE: loop exit
PB: predicated region body
PF: predicated region fallthrough
CT: control target
= control target key end

     0   :  { %vm25_vm0 = vcmask 261120   ;;  %v175_v14 = vmov 0.0   ;;  %vm176_vm1 = vmmov 0   ;;  %vm143_vm6 = vcmask 523264   ;;  %s245_s0 = inlined_call_operand.vmem [shape: f32[16,32], index: 0, kind: input, shape index: {}]   ;;  %s246_s3 = inlined_call_operand.vmem [shape: f32[32,64], index: 3, kind: input, shape index: {}]   ;;  %s247_s1 = inlined_call_operand.vmem [shape: f32[1,32], index: 1, kind: input, shape index: {}]   ;;  %s248_s2 = inlined_call_operand.vmem [shape: f32[1,32], index: 2, kind: input, shape index: {}]   ;;  %s249_s4 = inlined_call_operand.vmem [shape: f32[1,64], index: 4, kind: input, shape index: {}]   ;;  %s250_s5 = inlined_call_operand.vmem [shape: f32[16,64], index: 5, kind: output, shape index: {}]  }
   0x1   :  { %v21_v0 = vld [vmem:[%s245_s0] sm:$0xff]  ;;  %v22_v1 = vld [vmem:[%s245_s0 + $0x8] sm:$0xff]  ;;  %157 = vmatprep.subr.bf16.mxu0 %v175_v14  ;;  %v86_v17 = vld [vmem:[%s246_s3 + $0x10] sm:$0xff]  ;;  %161 = vmatprep.mubr.msk.bf16.mxu0 %vm176_vm1, %v175_v14 }
   0x2   :  { %v26_v2 = vsel %vm25_vm0, %v21_v0, 0.0  ;;  %v29_v3 = vsel %vm25_vm0, %v22_v1, 0.0  ;;  %v84_v15 = vld [vmem:[%s246_s3] sm:$0xff]  ;;  %v85_v16 = vld [vmem:[%s246_s3 + $0x8] sm:$0xff]  ;;  %v87_v19 = vld [vmem:[%s246_s3 + $0x18] sm:$0xff] }
   0x3   :  { %27 = vadd.xlane.f32.xlu0 %v26_v2  ;;  %v88_v18 = vpack.c.bf16 %v85_v16, %v84_v15  ;;  %v89_v20 = vpack.c.bf16 %v87_v19, %v86_v17  ;;  %v150_v37 = vld [vmem:[%s247_s1] ss:$0 sm:$0xff] }
   0x4   :  { %v151_v43 = vld [vmem:[%s248_s2] ss:$0 sm:$0xff] }
   0x5   :  { %158 = vmatpush3.bf16.msra.mxu0 %v88_v18  ;;  %v152_v48 = vld [vmem:[%s249_s4] ss:$0 sm:$0xff] }
   0x6   :  { %159 = vmatprep.subr.bf16.mxu0 %v175_v14 }
   0x7   :  { %30 = vadd.xlane.f32.xlu0 %v29_v3 }
   0x9   :  { %160 = vmatpush3.bf16.msra.mxu0 %v89_v20 }
  0x90   :  { %v28_v4 = vpop.xlane.xlu0 %27 }
  0x91   :  { %v33_v5 = vmul.f32 0.03125, %v28_v4 }
  0x93   :  { %v35_v6 = vsub.f32 %v21_v0, %v33_v5 }
  0x94   :  { %v31_v7 = vpop.xlane.xlu0 %30 }
  0x95   :  { %v34_v8 = vmul.f32 0.03125, %v31_v7  ;;  %v37_v9 = vmul.f32 %v35_v6, %v35_v6  ;;  %v71_v39 = vmul.f32 %v150_v37, %v35_v6 }
  0x97   :  { %v36_v10 = vsub.f32 %v22_v1, %v34_v8  ;;  %v39_v11 = vsel %vm25_vm0, %v37_v9, 0.0 }
  0x98   :  { %40 = vadd.xlane.f32.xlu1 %v39_v11 }
  0x99   :  { %v38_v12 = vmul.f32 %v36_v10, %v36_v10  ;;  %v72_v40 = vmul.f32 %v150_v37, %v36_v10 }
  0x9b   :  { %v42_v13 = vsel %vm25_vm0, %v38_v12, 0.0 }
  0x9c   :  { %43 = vadd.xlane.f32.xlu1 %v42_v13 }
 0x125   :  { %v41_v21 = vpop.xlane.xlu1 %40 }
 0x126   :  { %v45_v22 = vmul.f32 0.032258064, %v41_v21 }
 0x128   :  { %167 = vrsqrt.f32 %v45_v22  ;;  %vm49_vm2 = vcmp.eq.f32.partialorder %v45_v22, inf  ;;  %v52_v27 = vand.u32 2147483648, %v45_v22  ;;  %vm51_vm3 = vcmp.eq.f32.partialorder %v45_v22, 0.0 }
 0x129   :  { %v44_v23 = vpop.xlane.xlu1 %43 }
 0x12a   :  { %v46_v24 = vmul.f32 0.032258064, %v44_v23 }
 0x12c   :  { %169 = vrsqrt.f32 %v46_v24  ;;  %vm56_vm4 = vcmp.eq.f32.partialorder %v46_v24, inf  ;;  %v59_v33 = vand.u32 2147483648, %v46_v24  ;;  %vm58_vm5 = vcmp.eq.f32.partialorder %v46_v24, 0.0 }
 0x132   :  { %v168_v25 = vpop.eup %167 }
 0x133   :  { %v48_v26 = vmul.f32 %v168_v25, %v45_v22 }
 0x135   :  { %v50_v28 = vsel %vm49_vm2, %v45_v22, %v48_v26 }
 0x136   :  { %v170_v29 = vpop.eup %169  ;;  %v53_v30 = vsel %vm51_vm3, %v52_v27, %v50_v28 }
 0x137   :  { %v61_v31 = vadd.f32 1e-06, %v53_v30  ;;  %v55_v32 = vmul.f32 %v170_v29, %v46_v24 }
 0x139   :  { %171 = vrcp.f32 %v61_v31  ;;  %v57_v34 = vsel %vm56_vm4, %v46_v24, %v55_v32 }
 0x13a   :  { %v60_v35 = vsel %vm58_vm5, %v59_v33, %v57_v34 }
 0x13b   :  { %v62_v36 = vadd.f32 1e-06, %v60_v35 }
 0x13d   :  { %173 = vrcp.f32 %v62_v36 }
 0x143   :  { %v172_v38 = vpop.eup %171 }
 0x144   :  { %v73_v41 = vmul.f32 %v172_v38, %v71_v39 }
 0x146   :  { %v81_v45 = vadd.f32 %v151_v43, %v73_v41 }
 0x147   :  { %v174_v42 = vpop.eup %173 }
 0x148   :  { %v74_v44 = vmul.f32 %v174_v42, %v72_v40 }
 0x14a   :  { %v82_v46 = vadd.f32 %v151_v43, %v74_v44 }
 0x14c   :  { %v83_v47 = vpack.c.bf16 %v82_v46, %v81_v45 }
 0x14e   :  { %162 = vmatmul.mubr.msk.bf16.vlgmr.msra.gmra.mrb[0].mxu0 %vm25_vm0, %v83_v47 }
 0x221   :  { %v134_v49 = vpop.f32.mrb[0].mxu0 }
 0x222   :  { %v135_v50 = vadd.f32 %v152_v48, %v134_v49  ;;  %v163_v51 = vpop.f32.mrb[1].mxu0 }
 0x223   :  { %v137_v52 = vpop.f32.mrb[2].mxu0 }
 0x224   :  { %v141_v53 = vmax.f32 %v135_v50, 0.0  ;;  %v138_v54 = vadd.f32 %v152_v48, %v137_v52  ;;  %v164_v55 = vpop.f32.mrb[3].mxu0 }
 0x226   :  { %144 = vst.msk [vmem:[%s250_s5] sm:$0xff] %vm143_vm6, %v141_v53  ;;  %v142_v56 = vmax.f32 %v138_v54, 0.0 }
 0x228   :  { %145 = vst.msk [vmem:[%s250_s5 + $0x8] sm:$0xff] %vm143_vm6, %v142_v56 }

// kernel: _decoder_forward.29
= control target key start
LH: loop header
LB: loop body
LE: loop exit
PB: predicated region body
PF: predicated region fallthrough
CT: control target
= control target key end

     0   :  { %vm19_vm0 = vcmask 261120   ;;  %s185_s0 = inlined_call_operand.vmem [shape: f32[16,32], index: 0, kind: input, shape index: {}]   ;;  %s186_s1 = inlined_call_operand.vmem [shape: f32[1,32], index: 1, kind: input, shape index: {}]   ;;  %s187_s2 = inlined_call_operand.vmem [shape: f32[1,32], index: 2, kind: input, shape index: {}]   ;;  %s188_s3 = inlined_call_operand.hbm [shape: f32[16,32], index: 3, kind: output, shape index: {}]  }
   0x1   :  { %v15_v0 = vld [vmem:[%s185_s0] sm:$0xff]  ;;  %v16_v1 = vld [vmem:[%s185_s0 + $0x8] sm:$0xff] }
   0x2   :  { %v20_v2 = vsel %vm19_vm0, %v15_v0, 0.0 }
   0x3   :  { %8 = vsyncpa [#allocation3], 0  ;;  %21 = vadd.xlane.f32.xlu0 %v20_v2  ;;  %v23_v3 = vsel %vm19_vm0, %v16_v1, 0.0  ;;  %v95_v30 = vld [vmem:[%s186_s1] ss:$0 sm:$0xff]  ;;  %s132_s19 = smov [#allocation2]  }
   0x4   :  { %v96_v33 = vld [vmem:[%s187_s2] ss:$0 sm:$0xff]  ;;  %s84_s20 = sshll.u32 %s132_s19, 4  ;;  %s85_s20 = int_to_ptr.vmem [resolvable:$true] %s84_s20 }
   0x5   :  { %s108_s1 = scalar_lea.vmem %s85_s20, 256  ;;  %p113_p1 = scmp.lt.s32.totalorder %s85_s20, %s85_s20 }
   0x6   :  { %p109_p0 = scmp.ne.s32.totalorder %s85_s20, %s108_s1  ;;  %p114_p2 = scmp.lt.s32.totalorder %s108_s1, %s108_s1 }
   0x7   :  { %24 = vadd.xlane.f32.xlu0 %v23_v3 }
   0x8   :  { %p115_p3 = por %p114_p2, %p113_p1 }
   0xa   :  { %p116_p4 = pnand %p115_p3, %p109_p0 }
  0x90   :  { %v22_v4 = vpop.xlane.xlu0 %21 }
  0x91   :  { %v27_v5 = vmul.f32 0.03125, %v22_v4 }
  0x93   :  { %v29_v6 = vsub.f32 %v15_v0, %v27_v5 }
  0x94   :  { %v25_v7 = vpop.xlane.xlu0 %24 }
  0x95   :  { %v28_v8 = vmul.f32 0.03125, %v25_v7  ;;  %v31_v9 = vmul.f32 %v29_v6, %v29_v6  ;;  %v65_v31 = vmul.f32 %v95_v30, %v29_v6 }
  0x97   :  { %v30_v10 = vsub.f32 %v16_v1, %v28_v8  ;;  %v33_v11 = vsel %vm19_vm0, %v31_v9, 0.0 }
  0x98   :  { %34 = vadd.xlane.f32.xlu1 %v33_v11 }
  0x99   :  { %v32_v12 = vmul.f32 %v30_v10, %v30_v10  ;;  %v66_v35 = vmul.f32 %v95_v30, %v30_v10 }
  0x9b   :  { %v36_v13 = vsel %vm19_vm0, %v32_v12, 0.0 }
  0x9c   :  { %37 = vadd.xlane.f32.xlu1 %v36_v13 }
 0x125   :  { %v35_v14 = vpop.xlane.xlu1 %34 }
 0x126   :  { %v39_v15 = vmul.f32 0.032258064, %v35_v14 }
 0x128   :  { %100 = vrsqrt.f32 %v39_v15  ;;  %vm43_vm1 = vcmp.eq.f32.partialorder %v39_v15, inf  ;;  %v46_v20 = vand.u32 2147483648, %v39_v15  ;;  %vm45_vm2 = vcmp.eq.f32.partialorder %v39_v15, 0.0 }
 0x129   :  { %v38_v16 = vpop.xlane.xlu1 %37 }
 0x12a   :  { %v40_v17 = vmul.f32 0.032258064, %v38_v16 }
 0x12c   :  { %102 = vrsqrt.f32 %v40_v17  ;;  %vm50_vm3 = vcmp.eq.f32.partialorder %v40_v17, inf  ;;  %v53_v26 = vand.u32 2147483648, %v40_v17  ;;  %vm52_vm4 = vcmp.eq.f32.partialorder %v40_v17, 0.0 }
 0x132   :  { %v101_v18 = vpop.eup %100 }
 0x133   :  { %v42_v19 = vmul.f32 %v101_v18, %v39_v15 }
 0x135   :  { %v44_v21 = vsel %vm43_vm1, %v39_v15, %v42_v19 }
 0x136   :  { %v103_v22 = vpop.eup %102  ;;  %v47_v23 = vsel %vm45_vm2, %v46_v20, %v44_v21 }
 0x137   :  { %v55_v24 = vadd.f32 1e-06, %v47_v23  ;;  %v49_v25 = vmul.f32 %v103_v22, %v40_v17 }
 0x139   :  { %104 = vrcp.f32 %v55_v24  ;;  %v51_v27 = vsel %vm50_vm3, %v40_v17, %v49_v25 }
 0x13a   :  { %v54_v28 = vsel %vm52_vm4, %v53_v26, %v51_v27 }
 0x13b   :  { %v56_v29 = vadd.f32 1e-06, %v54_v28 }
 0x13d   :  { %106 = vrcp.f32 %v56_v29 }
 0x143   :  { %v105_v32 = vpop.eup %104 }
 0x144   :  { %v67_v34 = vmul.f32 %v105_v32, %v65_v31 }
 0x146   :  { %v75_v36 = vadd.f32 %v96_v33, %v67_v34 }
 0x147   :  { %v107_v37 = vpop.eup %106 }
 0x148   :  { %v68_v38 = vmul.f32 %v107_v37, %v66_v35  ;;  %77 = vst.msk [vmem:[#allocation2] sm:$0xff] %vm19_vm0, %v75_v36 }
 0x14a   :  { %v76_v39 = vadd.f32 %v96_v33, %v68_v38 }
 0x14c   :  { %78 = vst.msk [vmem:[#allocation2 + $0x8] sm:$0xff] %vm19_vm0, %v76_v39 }
 0x14d   :  { %119 = shalt.err (!%p116_p4)
}
 0x14e   :  { %s120_s22 = scalar_lea.hbm %s188_s3, 256 }
 0x14f   :  { %p121_p5 = scmp.ne.s32.totalorder %s188_s3, %s120_s22  ;;  %p124_p6 = scmp.lt.u32.totalorder %s120_s22, %s188_s3 }
 0x151   :  { %p126_p7 = pnand %p124_p6, %p121_p5 }
 0x153   :  { %129 = shalt.err (!%p126_p7)
}
 0x154   :  { %s133_s27 = smov 128   ;;  %s134_s28 = smov 8  }
 0x155   :  { %90 = dma.vmem_to_hbm [thread:$0]  %s85_s20, 256, %s188_s3, [#allocation3], %s133_s27, %s133_s27, %s134_s28  }
 0x156   :  { %130 = dma.done.wait [#allocation3], 256  }
 0x157   :  { %131 = vsyncadd [#allocation3], 4294967040 }
 0x158   :  { %94 = vsyncpa [#allocation3], 1 }

// kernel: _decoder_forward.21
= control target key start
LH: loop header
LB: loop body
LE: loop exit
PB: predicated region body
PF: predicated region fallthrough
CT: control target
= control target key end

     0   :  { %v117_v0 = vmov 0.0   ;;  %vm118_vm0 = vmmov 0   ;;  %vm40_vm1 = vcmask 523264   ;;  %vm89_vm2 = vcmask 261120   ;;  %s189_s1 = inlined_call_operand.vmem [shape: f32[64,32], index: 1, kind: input, shape index: {}]   ;;  %s190_s0 = inlined_call_operand.vmem [shape: f32[16,64], index: 0, kind: input, shape index: {}]   ;;  %s191_s2 = inlined_call_operand.vmem [shape: f32[1,32], index: 2, kind: input, shape index: {}]   ;;  %s192_s3 = inlined_call_operand.vmem [shape: f32[16,32], index: 3, kind: input, shape index: {}]   ;;  %s193_s4 = inlined_call_operand.vmem [shape: f32[16,32], index: 4, kind: output, shape index: {}]  }
   0x1   :  { %103 = vmatprep.subr.bf16.mxu0 %v117_v0  ;;  %v21_v1 = vld [vmem:[%s189_s1] sm:$0xff]  ;;  %v22_v2 = vld [vmem:[%s189_s1 + $0x8] sm:$0xff]  ;;  %v23_v3 = vld [vmem:[%s189_s1 + $0x10] sm:$0xff]  ;;  %111 = vmatprep.mubr.msk.bf16.mxu0 %vm118_vm0, %v117_v0 }
   0x2   :  { %v29_v4 = vpack.c.bf16 %v22_v2, %v21_v1  ;;  %v24_v5 = vld [vmem:[%s189_s1 + $0x18] sm:$0xff]  ;;  %v25_v7 = vld [vmem:[%s189_s1 + $0x20] sm:$0xff]  ;;  %v26_v8 = vld [vmem:[%s189_s1 + $0x28] sm:$0xff] }
   0x3   :  { %v30_v6 = vpack.c.bf16 %v24_v5, %v23_v3  ;;  %v31_v9 = vpack.c.bf16 %v26_v8, %v25_v7  ;;  %v27_v10 = vld [vmem:[%s189_s1 + $0x30] sm:$0xff]  ;;  %v28_v11 = vld [vmem:[%s189_s1 + $0x38] sm:$0xff]  ;;  %v18_v13 = vld [vmem:[%s190_s0] sm:$0xff] }
   0x4   :  { %104 = vmatpush3.bf16.msra.mxu0 %v29_v4  ;;  %v32_v12 = vpack.c.bf16 %v28_v11, %v27_v10  ;;  %v19_v14 = vld [vmem:[%s190_s0 + $0x8] sm:$0xff]  ;;  %v96_v16 = vld [vmem:[%s191_s2] ss:$0 sm:$0xff] }
   0x5   :  { %105 = vmatprep.subr.bf16.mxu0 %v117_v0  ;;  %v20_v15 = vpack.c.bf16 %v19_v14, %v18_v13  ;;  %v85_v18 = vld [vmem:[%s192_s3] sm:$0xff]  ;;  %v86_v22 = vld [vmem:[%s192_s3 + $0x8] sm:$0xff] }
   0x8   :  { %106 = vmatpush3.bf16.msra.mxu0 %v30_v6 }
   0x9   :  { %107 = vmatprep.subr.bf16.mxu0 %v117_v0 }
   0xc   :  { %108 = vmatpush3.bf16.msra.mxu0 %v31_v9 }
   0xd   :  { %109 = vmatprep.subr.bf16.mxu0 %v117_v0 }
  0x10   :  { %110 = vmatpush3.bf16.msra.mxu0 %v32_v12 }
  0x13   :  { %112 = vmatmul.mubr.msk.bf16.vlgmr.msra.gmra.mrb[0].mxu0 %vm40_vm1, %v20_v15 }
  0xe6   :  { %v78_v17 = vpop.f32.mrb[0].mxu0 }
  0xe7   :  { %v79_v19 = vadd.f32 %v96_v16, %v78_v17  ;;  %v113_v20 = vpop.f32.mrb[1].mxu0 }
  0xe8   :  { %v81_v21 = vpop.f32.mrb[2].mxu0 }
  0xe9   :  { %v87_v23 = vadd.f32 %v85_v18, %v79_v19  ;;  %v82_v24 = vadd.f32 %v96_v16, %v81_v21  ;;  %v114_v25 = vpop.f32.mrb[3].mxu0 }
  0xeb   :  { %90 = vst.msk [vmem:[%s193_s4] sm:$0xff] %vm89_vm2, %v87_v23  ;;  %v88_v26 = vadd.f32 %v86_v22, %v82_v24 }
  0xed   :  { %91 = vst.msk [vmem:[%s193_s4 + $0x8] sm:$0xff] %vm89_vm2, %v88_v26 }

// kernel: _decoder_forward.19
= control target key start
LH: loop header
LB: loop body
LE: loop exit
PB: predicated region body
PF: predicated region fallthrough
CT: control target
= control target key end

     0   :  { %s1106_s21 = smov 0   ;;  %s1230_s0 = inlined_call_operand.vmem [shape: f32[2,8,32], index: 0, kind: input, shape index: {}]   ;;  %s1231_s1 = inlined_call_operand.vmem [shape: f32[2,8,64], index: 1, kind: input, shape index: {}]   ;;  %s1232_s2 = inlined_call_operand.vmem [shape: f32[2,1,8], index: 2, kind: input, shape index: {}]   ;;  %s1233_s3 = inlined_call_operand.vmem [shape: f32[32,32], index: 3, kind: input, shape index: {}]   ;;  %s1234_s4 = inlined_call_operand.vmem [shape: f32[1,32], index: 4, kind: input, shape index: {}]   ;;  %s1235_s5 = inlined_call_operand.vmem [shape: f32[2,8,32], index: 5, kind: input, shape index: {}]   ;;  %s1236_s6 = inlined_call_operand.vmem [shape: f32[2,8,32], index: 6, kind: output, shape index: {}]  }
   0x1 LB: > { %s917_s22 = sadd.s32 4294967295, %s1056_s21   ;;  %p921_p0 = scmp.ge.s32.totalorder %s1056_s21, 1  ;;  %s1056_s21 = sphi %s1106_s21, %s16_s21  }
   0x2   : > { %p237_p1 = scmp.lt.s32.totalorder %s1056_s21, 3 }
   0x4   : > { %p238_p2 = pnand %p921_p0, %p237_p1 }
   0x5   : > { %p276_p3 = scmp.lt.s32.totalorder (!%p238_p2), %s917_s22, 1  ;;  %v1058_v0 = vmov (!%p238_p2), 0.0   ;;  %vm1059_vm0 = vmmov (!%p238_p2), 0   ;;  %vm302_vm1 = vcmask (!%p238_p2), 64512   ;;  %v351_v7 = vlaneseq (!%p238_p2)  ;;  %s1061_s9 = smov (!%p238_p2), 96  }
   0x6   : > { %241 = sbr.rel (%p238_p2) target bundleno = 1657 (0x679), region = 44  ;;  %957 = vmatprep.subr.bf16.mxu0 (!%p238_p2), %v1058_v0  ;;  %959 = vmatprep.mubr.msk.bf16.mxu0 (!%p238_p2), %vm1059_vm0, %v1058_v0  ;;  %v1060_v11 = vmov (!%p238_p2), 0   ;;  %s1062_s10 = smov (!%p238_p2), 120   ;;  %vm375_vm4 = vcmask (!%p238_p2), 1043456   ;;  %vm766_vm5 = vcmask (!%p238_p2), 130048   ;;  %vm768_vm6 = vcmask (!%p238_p2), 195584  }
   0x7   : > { %963 = vmatprep.subr.bf16.mxu1 (!%p238_p2), %v1058_v0  ;;  %965 = vmatprep.mubr.msk.bf16.mxu1 (!%p238_p2), %vm1059_vm0, %v1058_v0  ;;  %v352_v9 = vshrl.u32 (!%p238_p2), %v351_v7, 7  ;;  %s1063_s11 = smov (!%p238_p2), 112   ;;  %s1064_s12 = smov (!%p238_p2), 104   ;;  %vm784_vm7 = vcmask (!%p238_p2), 261120  }
   0x8   : > { %s1065_s13 = smov (!%p238_p2), 88   ;;  %s1066_s14 = smov (!%p238_p2), 72  }
   0x9   : > { %v353_v10 = vsub.s32 (!%p238_p2), 0, %v352_v9  ;;  %s1067_s15 = smov (!%p238_p2), 80   ;;  %s1068_s20 = smov (!%p238_p2), 8  }
   0xa   : > { %s1069_s27 = smov (!%p238_p2), 16   ;;  %s1070_s28 = smov (!%p238_p2), 24  }
   0xd   : > { %s1238_s22 = smov (!%p276_p3, %s917_s22), 1 }
   0xe   : > { %s1120_s23 = sshll.u32 %s1238_s22, 3  ;;  %s286_s8 = scalar_lea.vmem %s1232_s2, %s1238_s22 }
   0xf   : > { %s283_s26 = scalar_lea.vmem %s1231_s1, %s1120_s23  ;;  %s279_s29 = scalar_lea.vmem %s1230_s0, %s1120_s23  ;;  %v298_v8 = vld [vmem:[%s286_s8] sm:$0x1] }
  0x10   : > { %v296_v1 = vld [vmem:[%s283_s26] sm:$0xff]  ;;  %vm349_vm2 = vcmp.gt.f32.partialorder %v298_v8, 0.0  ;;  %s290_s7 = scalar_lea.vmem %s1235_s5, %s1120_s23 }
  0x11   : > { %v297_v2 = vld [vmem:[%s279_s29] sm:$0xff]  ;;  %v1130_v3 = vpack.c.bf16 %v296_v1, %v296_v1  ;;  %v350_v12 = vsel %vm349_vm2, 1, %v1060_v11 }
  0x12   : > { %v299_v5 = vmul.f32 0.35355338, %v297_v2  ;;  %v1141_v13 = vrot.slane %v350_v12, %v353_v10 }
  0x13   : > { %v307_v4 = vsel %vm302_vm1, %v1130_v3, 0  ;;  %370 = vrot.lane.b32.xlu1 %v1130_v3, %s1061_s9 }
  0x14   : > { %958 = vmatpush3.bf16.xpose.msra.mxu0 %v307_v4  ;;  %v300_v6 = vpack.c.bf16 %v299_v5, %v299_v5  ;;  %vm355_vm3 = vcmp.eq.s32.totalorder %v1141_v13, 1 }
  0x15   : > { %975 = vmatprep.subr.bf16.mxu0 %v1058_v0 }
  0x17   : > { %422 = vrot.lane.b32.xlu1 %v1130_v3, %s1062_s10 }
  0x1b   : > { %960 = vmatmul.mubr.msk.bf16.vlgmr.msra.gmra.mrb[0].mxu0 %vm302_vm1, %v300_v6  ;;  %533 = vrot.lane.b32.xlu1 %v1130_v3, %s1063_s11 }
  0x1c   : > { %977 = vmatprep.mubr.msk.bf16.mxu0 %vm1059_vm0, %v1058_v0 }
  0x1f   : > { %531 = vrot.lane.b32.xlu1 %v300_v6, %s1063_s11 }
  0x23   : > { %644 = vrot.lane.b32.xlu1 %v1130_v3, %s1064_s12 }
  0x27   : > { %642 = vrot.lane.b32.xlu1 %v300_v6, %s1064_s12  ;;  %s294_s12 = scalar_lea.vmem %s1236_s6, %s1120_s23 }
  0x85   : > { %v371_v25 = vpop.permute.xlu1 %370 }
  0x86   : > { %v377_v26 = vsel %vm375_vm4, %v371_v25, 0 }
  0x87   : > { %964 = vmatpush3.bf16.msra.mxu1 %v377_v26 }
  0x88   : > { %969 = vmatprep.subr.bf16.mxu1 %v1058_v0 }
  0x89   : > { %v423_v29 = vpop.permute.xlu1 %422 }
  0x8a   : > { %v428_v31 = vsel %vm302_vm1, %v423_v29, 0 }
  0x8d   : > { %v534_v33 = vpop.permute.xlu1 %533 }
  0x8e   : > { %v539_v36 = vsel %vm302_vm1, %v534_v33, 0  ;;  %v772_v33 = vld [vmem:[%s1233_s3 + $0x8] sm:$0xff] }
  0x91   : > { %v532_v35 = vpop.permute.xlu1 %531 }
  0x95   : > { %v645_v37 = vpop.permute.xlu1 %644 }
  0x96   : > { %v650_v38 = vsel %vm302_vm1, %v645_v37, 0 }
  0x99   : > { %v643_v39 = vpop.permute.xlu1 %642 }
  0xee   : > { %v343_v14 = vpop.f32.mrb[0].mxu0 }
  0xef   : > { %v356_v15 = vsel %vm355_vm3, %v343_v14, -1e+09  ;;  %v961_v16 = vpop.f32.mrb[1].mxu0 }
  0xf0   : > { %v346_v17 = vpop.f32.mrb[2].mxu0  ;;  %v357_v18 = vsel %vm302_vm1, %v356_v15, -inf }
  0xf1   : > { %358 = vmax.xlane.f32.xlu0 %v357_v18  ;;  %v962_v19 = vpop.f32.mrb[3].mxu0 }
 0x17e   : > { %v359_v20 = vpop.xlane.xlu0 %358 }
 0x17f   : > { %v360_v21 = vsub.f32 %v356_v15, %v359_v20 }
 0x181   : > { %v361_v22 = vmul.f32 1.442695, %v360_v21 }
 0x183   : > { %1034 = vpow2.f32 %v361_v22 }
 0x18d   : > { %v1035_v23 = vpop.eup %1034 }
 0x18e   : > { %v363_v24 = vsel %vm302_vm1, %v1035_v23, 0.0 }
 0x18f   : > { %364 = vadd.xlane.f32.xlu0 %v363_v24 }
 0x1a5   : > { %420 = vrot.lane.b32.xlu0 %v300_v6, %s1062_s10 }
 0x21c   : > { %v365_v27 = vpop.xlane.xlu0 %364 }
 0x21d   : > { %1036 = vrcp.f32 %v365_v27 }
 0x220   : > { %v421_v34 = vpop.permute.xlu0 %420 }
 0x227   : > { %v1037_v28 = vpop.eup %1036 }
 0x228   : > { %v367_v30 = vmul.f32 %v1037_v28, %v1035_v23 }
 0x22a   : > { %v368_v32 = vpack.c.bf16 %v367_v30, %v367_v30 }
 0x22c   : > { %966 = vmatmul.mubr.msk.bf16.vlgmr.msra.gmra.mrb[0].mxu1 %vm302_vm1, %v368_v32  ;;  %v771_v32 = vld [vmem:[%s1233_s3] sm:$0xff] }
 0x22d   : > { %970 = vmatpush3.bf16.xpose.msra.mxu1 %v428_v31  ;;  %971 = vmatprep.mubr.msk.bf16.mxu1 %vm1059_vm0, %v1058_v0 }
 0x22e   : > { %981 = vmatprep.subr.bf16.mxu1 %v1058_v0 }
 0x234   : > { %972 = vmatmul.mubr.msk.bf16.vlgmr.msra.gmra.mrb[4].mxu1 %vm302_vm1, %v421_v34  ;;  %v775_v34 = vpack.c.bf16 %v772_v33, %v771_v32 }
 0x235   : > { %982 = vmatpush3.bf16.xpose.msra.mxu1 %v539_v36  ;;  %983 = vmatprep.mubr.msk.bf16.mxu1 %vm1059_vm0, %v1058_v0 }
 0x236   : > { %993 = vmatprep.subr.bf16.mxu1 %v1058_v0 }
 0x23c   : > { %984 = vmatmul.mubr.msk.bf16.vlgmr.msra.gmra.mrb[8].mxu1 %vm302_vm1, %v532_v35 }
 0x23d   : > { %994 = vmatpush3.bf16.xpose.msra.mxu1 %v650_v38  ;;  %995 = vmatprep.mubr.msk.bf16.mxu1 %vm1059_vm0, %v1058_v0  ;;  %v773_v38 = vld [vmem:[%s1233_s3 + $0x10] sm:$0xff] }
 0x23e   : > { %1005 = vmatprep.subr.bf16.mxu1 %v1058_v0 }
 0x244   : > { %996 = vmatmul.mubr.msk.bf16.vlgmr.msra.gmra.mrb[12].mxu1 %vm302_vm1, %v643_v39  ;;  %v774_v39 = vld [vmem:[%s1233_s3 + $0x18] sm:$0xff] }
 0x245   : > { %1009 = vmatprep.mubr.msk.bf16.mxu1 %vm1059_vm0, %v1058_v0  ;;  %1006 = vmatpush3.bf16.msra.mxu1 %v775_v34 }
 0x246   : > { %1007 = vmatprep.subr.bf16.mxu1 %v1058_v0 }
 0x2ff   : > { %v1172_v40 = vpop.f32.mrb[0].mxu1 }
 0x300   : > { %v967_v41 = vpop.f32.mrb[1].mxu1 }
 0x301   : > { %v416_v42 = vpop.f32.mrb[2].mxu1 }
 0x302   : > { %v968_v43 = vpop.f32.mrb[3].mxu1  ;;  %v776_v42 = vpack.c.bf16 %v774_v39, %v773_v38 }
 0x304   : > { %1008 = vmatpush3.bf16.msra.mxu1 %v776_v42 }
 0x307   : > { %v464_v44 = vpop.f32.mrb[4].mxu1 }
 0x308   : > { %v470_v45 = vsel %vm355_vm3, %v464_v44, -1e+09  ;;  %v973_v46 = vpop.f32.mrb[5].mxu1 }
 0x309   : > { %v467_v47 = vpop.f32.mrb[6].mxu1  ;;  %v471_v48 = vsel %vm302_vm1, %v470_v45, -inf }
 0x30a   : > { %472 = vmax.xlane.f32.xlu1 %v471_v48  ;;  %v974_v49 = vpop.f32.mrb[7].mxu1 }
 0x30f   : > { %v575_v50 = vpop.f32.mrb[8].mxu1 }
 0x310   : > { %v581_v51 = vsel %vm355_vm3, %v575_v50, -1e+09  ;;  %v985_v52 = vpop.f32.mrb[9].mxu1 }
 0x311   : > { %v578_v53 = vpop.f32.mrb[10].mxu1  ;;  %v582_v54 = vsel %vm302_vm1, %v581_v51, -inf }
 0x312   : > { %583 = vmax.xlane.f32.xlu0 %v582_v54  ;;  %v986_v55 = vpop.f32.mrb[11].mxu1 }
 0x317   : > { %v686_v56 = vpop.f32.mrb[12].mxu1 }
 0x318   : > { %v692_v57 = vsel %vm355_vm3, %v686_v56, -1e+09  ;;  %v997_v58 = vpop.f32.mrb[13].mxu1 }
 0x319   : > { %v689_v59 = vpop.f32.mrb[14].mxu1  ;;  %v693_v60 = vsel %vm302_vm1, %v692_v57, -inf }
 0x31a   : > { %694 = vmax.xlane.f32.xlu1 %v693_v60  ;;  %v998_v61 = vpop.f32.mrb[15].mxu1  ;;  %v828_v59 = vld [vmem:[%s290_s7] sm:$0xff] }
 0x32b   : > { %483 = vrot.lane.b32.xlu1 %v1130_v3, %s1065_s13 }
 0x397   : > { %v473_v62 = vpop.xlane.xlu1 %472 }
 0x398   : > { %v474_v63 = vsub.f32 %v470_v45, %v473_v62 }
 0x39a   : > { %v475_v1 = vmul.f32 1.442695, %v474_v63 }
 0x39c   : > { %1038 = vpow2.f32 %v475_v1 }
 0x39f   : > { %v584_v2 = vpop.xlane.xlu0 %583 }
 0x3a0   : > { %v585_v4 = vsub.f32 %v581_v51, %v584_v2 }
 0x3a2   : > { %v586_v5 = vmul.f32 1.442695, %v585_v4 }
 0x3a4   : > { %1040 = vpow2.f32 %v586_v5 }
 0x3a6   : > { %v1039_v6 = vpop.eup %1038 }
 0x3a7   : > { %v695_v7 = vpop.xlane.xlu1 %694  ;;  %v477_v8 = vsel %vm302_vm1, %v1039_v6, 0.0 }
 0x3a8   : > { %v696_v9 = vsub.f32 %v692_v57, %v695_v7  ;;  %478 = vadd.xlane.f32.xlu0 %v477_v8  ;;  %v934_v57 = vld [vmem:[%s1234_s4] ss:$0 sm:$0xff] }
 0x3aa   : > { %v697_v10 = vmul.f32 1.442695, %v696_v9 }
 0x3ab   : > { %v484_v11 = vpop.permute.xlu1 %483 }
 0x3ac   : > { %1042 = vpow2.f32 %v697_v10  ;;  %v489_v12 = vsel %vm375_vm4, %v484_v11, 0 }
 0x3ad   : > { %976 = vmatpush3.bf16.msra.mxu0 %v489_v12 }
 0x3ae   : > { %v1041_v13 = vpop.eup %1040  ;;  %987 = vmatprep.subr.bf16.mxu0 %v1058_v0 }
 0x3af   : > { %v588_v14 = vsel %vm302_vm1, %v1041_v13, 0.0 }
 0x3b0   : > { %589 = vadd.xlane.f32.xlu1 %v588_v14 }
 0x3b6   : > { %v1043_v15 = vpop.eup %1042 }
 0x3b7   : > { %v699_v16 = vsel %vm302_vm1, %v1043_v15, 0.0 }
 0x3b8   : > { %700 = vadd.xlane.f32.xlu0 %v699_v16 }
 0x3c1   : > { %705 = vrot.lane.b32.xlu1 %v1130_v3, %s1066_s14 }
 0x3ce   : > { %594 = vrot.lane.b32.xlu0 %v1130_v3, %s1067_s15 }
 0x435   : > { %v479_v17 = vpop.xlane.xlu0 %478 }
 0x436   : > { %1044 = vrcp.f32 %v479_v17 }
 0x43d   : > { %v590_v18 = vpop.xlane.xlu1 %589 }
 0x43e   : > { %1046 = vrcp.f32 %v590_v18 }
 0x440   : > { %v1045_v19 = vpop.eup %1044 }
 0x441   : > { %v481_v20 = vmul.f32 %v1045_v19, %v1039_v6  ;;  %v706_v26 = vpop.permute.xlu1 %705 }
 0x442   : > { %v711_v28 = vsel %vm375_vm4, %v706_v26, 0 }
 0x443   : > { %v482_v21 = vpack.c.bf16 %v481_v20, %v481_v20 }
 0x445   : > { %v701_v22 = vpop.xlane.xlu0 %700  ;;  %978 = vmatmul.mubr.msk.bf16.vlgmr.msra.gmra.mrb[4].mxu0 %vm302_vm1, %v482_v21 }
 0x446   : > { %1048 = vrcp.f32 %v701_v22  ;;  %989 = vmatprep.mubr.msk.bf16.mxu0 %vm1059_vm0, %v1058_v0 }
 0x448   : > { %v1047_v23 = vpop.eup %1046 }
 0x449   : > { %v592_v24 = vmul.f32 %v1047_v23, %v1041_v13  ;;  %v595_v25 = vpop.permute.xlu0 %594 }
 0x44a   : > { %v600_v3 = vsel %vm375_vm4, %v595_v25, 0 }
 0x44b   : > { %988 = vmatpush3.bf16.msra.mxu0 %v600_v3  ;;  %v593_v27 = vpack.c.bf16 %v592_v24, %v592_v24 }
 0x44c   : > { %999 = vmatprep.subr.bf16.mxu0 %v1058_v0 }
 0x44e   : > { %990 = vmatmul.mubr.msk.bf16.vlgmr.msra.gmra.mrb[8].mxu0 %vm302_vm1, %v593_v27 }
 0x44f   : > { %1000 = vmatpush3.bf16.msra.mxu0 %v711_v28  ;;  %1001 = vmatprep.mubr.msk.bf16.mxu0 %vm1059_vm0, %v1058_v0 }
 0x450   : > { %v1049_v29 = vpop.eup %1048 }
 0x451   : > { %v703_v30 = vmul.f32 %v1049_v29, %v1043_v15 }
 0x453   : > { %v704_v31 = vpack.c.bf16 %v703_v30, %v703_v30 }
 0x456   : > { %1002 = vmatmul.mubr.msk.bf16.vlgmr.msra.gmra.mrb[12].mxu0 %vm302_vm1, %v704_v31 }
 0x518   : > { %v525_v35 = vpop.f32.mrb[4].mxu0 }
 0x519   : > { %754 = vrot.lane.b32.xlu1 %v525_v35, %s1068_s20  ;;  %v979_v36 = vpop.f32.mrb[5].mxu0 }
 0x51a   : > { %v528_v37 = vpop.f32.mrb[6].mxu0 }
 0x51b   : > { %v980_v41 = vpop.f32.mrb[7].mxu0 }
 0x521   : > { %v636_v43 = vpop.f32.mrb[8].mxu0 }
 0x522   : > { %758 = vrot.lane.b32.xlu0 %v636_v43, %s1069_s27  ;;  %v991_v44 = vpop.f32.mrb[9].mxu0 }
 0x523   : > { %v639_v45 = vpop.f32.mrb[10].mxu0 }
 0x524   : > { %v992_v46 = vpop.f32.mrb[11].mxu0 }
 0x529   : > { %v747_v47 = vpop.f32.mrb[12].mxu0 }
 0x52a   : > { %762 = vrot.lane.b32.xlu1 %v747_v47, %s1070_s28  ;;  %v1003_v0 = vpop.f32.mrb[13].mxu0 }
 0x52b   : > { %v750_v48 = vpop.f32.mrb[14].mxu0 }
 0x52c   : > { %v1004_v49 = vpop.f32.mrb[15].mxu0 }
 0x58b   : > { %v755_v50 = vpop.permute.xlu1 %754 }
 0x58c   : > { %v765_v52 = vsel %vm302_vm1, %v1172_v40, %v755_v50 }
 0x594   : > { %v759_v51 = vpop.permute.xlu0 %758 }
 0x595   : > { %v767_v53 = vsel %vm766_vm5, %v765_v52, %v759_v51 }
 0x59c   : > { %v763_v54 = vpop.permute.xlu1 %762 }
 0x59d   : > { %v769_v55 = vsel %vm768_vm6, %v767_v53, %v763_v54 }
 0x59e   : > { %v770_v56 = vpack.c.bf16 %v769_v55, %v769_v55 }
 0x5a0   : > { %1010 = vmatmul.mubr.msk.bf16.vlgmr.msra.gmra.mrb[16].mxu1 %vm784_vm7, %v770_v56 }
 0x673   : > { %v822_v58 = vpop.f32.mrb[16].mxu1 }
 0x674   : > { %v823_v60 = vadd.f32 %v934_v57, %v822_v58  ;;  %v1011_v61 = vpop.f32.mrb[17].mxu1 }
 0x675   : > { %v825_v40 = vpop.f32.mrb[18].mxu1 }
 0x676   : > { %v829_v62 = vadd.f32 %v828_v59, %v823_v60  ;;  %v1012_v63 = vpop.f32.mrb[19].mxu1 }
 0x678   : > { %830 = vst.msk [vmem:[%s294_s12] sm:$0xff] %vm784_vm7, %v829_v62 }
 0x679 PF: > { %s16_s21 = sadd.s32 1, %s1056_s21  }
 0x67a   : > { %p13_p4 = scmp.ge.s32.totalorder %s16_s21, 4  }
 0x67c   :  { %15 = sbr.rel (!%p13_p4) target bundleno = 1 (0x1), region = 83 }

</bundles_post_ra>
